<compile_context>
chip_gen: v6e
topology: v6e:2x2x1
jax: 0.10.0
libtpu: 0.0.40
codegen_flags: <defaults>
</compile_context>

<pallas_src>
import jax
import jax.numpy as jnp
from jax.experimental import pallas as pl
from jax.experimental.pallas import tpu as pltpu

# --- shapes (small but lane-dense; module is parameterized on all of these) --
B, L, E = 16, 16, 128        # batch, seq_len, embedding_dim
BT = 8                       # batch tile  -> fused matmul M = BT*L = 128 rows
C = 128                      # conv_out_channels
KERNEL_SIZES = (3, 4, 5)
NK = len(KERNEL_SIZES)
TOTAL_TAPS = sum(KERNEL_SIZES)          # 12
H = 128                      # hidden_size   (kept a full 128-lane slab)
O = 128                      # output_size   (lane-dense final store)
MM_DTYPE = jnp.bfloat16      # MXU input dtype (f32 accumulation)

assert B % BT == 0


def textcnn_kernel(x_ref, wcat_ref, bcat_ref, pw1_ref, pb1_ref, pw2_ref,
                   pb2_ref, out_ref):
    # x_ref: (BT, L, E) bf16.  One aligned reshape (L=16 is a sublane multiple).
    x2 = x_ref[...].reshape(BT * L, E)

    # One fused MXU push for all conv taps: (BT*L, E) @ (E, TOTAL_TAPS*C).
    y = jnp.dot(x2, wcat_ref[...], preferred_element_type=jnp.float32)
    y = y.reshape(BT, L, TOTAL_TAPS * C)          # (BT, L, 12*C) f32

    bcat = bcat_ref[...]                          # (NK, C) f32
    h = None                                      # proj hidden accumulator
    tap_off = 0
    for b, k in enumerate(KERNEL_SIZES):
        l_out = L - k + 1
        # Shifted adds on the VPU (in (BT, L, ...) indexing: no cross-batch mix).
        # conv[:, l, :] = sum_dk x[:, l+dk, :] @ W[dk] = sum_dk y[:, l+dk, tap dk].
        c0 = tap_off * C
        acc = y[:, 0:l_out, c0:c0 + C]            # init from first tap (no zeros)
        for dk in range(1, k):                    # static unroll
            col = (tap_off + dk) * C
            acc = acc + y[:, dk:dk + l_out, col:col + C]
        # Max-pool over seq first, then bias + ReLU on the small (BT, C) tensor
        # (ReLU is monotonic and the bias is constant over L -> equivalent).
        pooled = jnp.maximum(jnp.max(acc, axis=1) + bcat[b][None, :], 0.0)
        # Fold the feature concat into the first proj matmul:
        #   feats @ pw1 == sum_b pooled_b @ pw1[b*C:(b+1)*C, :]
        hb = jnp.dot(pooled.astype(MM_DTYPE),
                     pw1_ref[b * C:(b + 1) * C, :],
                     preferred_element_type=jnp.float32)
        h = hb if h is None else h + hb
        tap_off += k

    h = jnp.maximum(h + pb1_ref[...], 0.0)        # Linear bias + ReLU
    # TODO(synk): Dropout with p>0 is not implemented (config uses p=0.0, an
    # identity); p>0 would need pltpu.prng_seed/prng_random_bits masking.
    out = jnp.dot(h.astype(MM_DTYPE), pw2_ref[...],
                  preferred_element_type=jnp.float32)
    out_ref[...] = (out + pb2_ref[...]).astype(out_ref.dtype)


def textcnn_forward(x, params):
    (w3, b3, w4, b4, w5, b5, pw1, pb1, pw2, pb2) = params

    # Wrapper-side layout plumbing: fuse all conv tap weights into one
    # lane-dense (E, 12*C) matrix; stack the conv biases.
    wcat = jnp.concatenate(
        [w[dk] for w, k in zip((w3, w4, w5), KERNEL_SIZES) for dk in range(k)],
        axis=1)                                    # (E, TOTAL_TAPS*C)
    bcat = jnp.concatenate([b3, b4, b5], axis=0)   # (NK, C)

    # bf16 matmul inputs (halves DMA / vreg packing); biases stay f32.
    x_mm = x.astype(MM_DTYPE)
    wcat_mm = wcat.astype(MM_DTYPE)
    pw1_mm = pw1.astype(MM_DTYPE)
    pw2_mm = pw2.astype(MM_DTYPE)

    grid = (B // BT,)
    in_specs = [
        pl.BlockSpec((BT, L, E), lambda i: (i, 0, 0)),          # x batch tile
        pl.BlockSpec(wcat_mm.shape, lambda i: (0, 0)),          # fused conv W
        pl.BlockSpec(bcat.shape, lambda i: (0, 0)),             # conv biases
        pl.BlockSpec(pw1_mm.shape, lambda i: (0, 0)),           # proj W1
        pl.BlockSpec(pb1.shape, lambda i: (0, 0)),              # proj b1
        pl.BlockSpec(pw2_mm.shape, lambda i: (0, 0)),           # proj W2
        pl.BlockSpec(pb2.shape, lambda i: (0, 0)),              # proj b2
    ]
    out_spec = pl.BlockSpec((BT, O), lambda i: (i, 0))

    return pl.pallas_call(
        textcnn_kernel,
        out_shape=jax.ShapeDtypeStruct((B, O), jnp.float32),
        grid=grid,
        in_specs=in_specs,
        out_specs=out_spec,
        compiler_params=pltpu.CompilerParams(
            dimension_semantics=("parallel",)),    # both v7x TCs get work
    )(x_mm, wcat_mm, bcat, pw1_mm, pb1, pw2_mm, pb2)


def textcnn_reference(x, params):
    """Pure-JAX f32 reference mirroring the PyTorch forward."""
    (w3, b3, w4, b4, w5, b5, pw1, pb1, pw2, pb2) = params
    pooled = []
    for w, b, k in zip((w3, w4, w5), (b3, b4, b5), KERNEL_SIZES):
        l_out = L - k + 1
        acc = jnp.zeros((x.shape[0], l_out, C), jnp.float32)
        for dk in range(k):
            acc = acc + jnp.einsum('ble,ec->blc', x[:, dk:dk + l_out, :], w[dk])
        acc = jnp.maximum(acc + b.reshape(1, 1, C), 0.0)      # ReLU
        pooled.append(jnp.max(acc, axis=1))                   # AdaptiveMaxPool1d(1)
    feats = jnp.concatenate(pooled, axis=-1)
    h = jnp.maximum(feats @ pw1 + pb1, 0.0)
    return h @ pw2 + pb2                                      # Dropout(p=0) = id


def init_params(key):
    ks = jax.random.split(key, 12)
    params = []
    for i, k in enumerate(KERNEL_SIZES):
        w = jax.random.normal(ks[2 * i], (k, E, C), jnp.float32) * 0.05
        b = jax.random.normal(ks[2 * i + 1], (1, C), jnp.float32) * 0.01
        params += [w, b]
    pw1 = jax.random.normal(ks[6], (NK * C, H), jnp.float32) * 0.05
    pb1 = jax.random.normal(ks[7], (1, H), jnp.float32) * 0.01
    pw2 = jax.random.normal(ks[8], (H, O), jnp.float32) * 0.05
    pb2 = jax.random.normal(ks[9], (1, O), jnp.float32) * 0.01
    params += [pw1, pb1, pw2, pb2]
    return tuple(params)


if __name__ == "__main__":
    key = jax.random.PRNGKey(0)
    kx, kp = jax.random.split(key)
    x = jax.random.normal(kx, (B, L, E), jnp.float32)
    params = init_params(kp)

    out = jax.block_until_ready(textcnn_forward(x, params))
    ref = jax.block_until_ready(textcnn_reference(x, params))

    assert out.shape == (B, O), out.shape
    # Tolerance accounts for bf16 matmul inputs (f32 accumulation) vs f32 ref.
    assert jnp.allclose(out, ref, atol=5e-2, rtol=5e-2), "mismatch vs reference"
    print("KERNEL_OK")
</pallas_src>

<mosaic_0001>
module attributes {stable_mosaic.version = 11 : i64} {
  func.func @textcnn_kernel(%arg0: i32, %arg1: memref<8x16x128xbf16, #tpu.memory_space<vmem>>, %arg2: memref<128x1536xbf16, #tpu.memory_space<vmem>>, %arg3: memref<3x128xf32, #tpu.memory_space<vmem>>, %arg4: memref<384x128xbf16, #tpu.memory_space<vmem>>, %arg5: memref<1x128xf32, #tpu.memory_space<vmem>>, %arg6: memref<128x128xbf16, #tpu.memory_space<vmem>>, %arg7: memref<1x128xf32, #tpu.memory_space<vmem>>, %arg8: memref<8x128xf32, #tpu.memory_space<vmem>>) attributes {dimension_semantics = [#tpu.dimension_semantics<parallel>], iteration_bounds = array<i64: 2>, scalar_prefetch = 0 : i64, scratch_operands = 0 : i64, tpu.core_type = #tpu.core_type<tc>, window_params = [{transform_indices = @transform_0, window_bounds = array<i64: 8, 16, 128>}, {pipeline_mode = #tpu.pipeline_mode<synchronous>, transform_indices = @transform_1, window_bounds = array<i64: 128, 1536>}, {pipeline_mode = #tpu.pipeline_mode<synchronous>, transform_indices = @transform_2, window_bounds = array<i64: 3, 128>}, {pipeline_mode = #tpu.pipeline_mode<synchronous>, transform_indices = @transform_3, window_bounds = array<i64: 384, 128>}, {pipeline_mode = #tpu.pipeline_mode<synchronous>, transform_indices = @transform_4, window_bounds = array<i64: 1, 128>}, {pipeline_mode = #tpu.pipeline_mode<synchronous>, transform_indices = @transform_5, window_bounds = array<i64: 128, 128>}, {pipeline_mode = #tpu.pipeline_mode<synchronous>, transform_indices = @transform_6, window_bounds = array<i64: 1, 128>}, {transform_indices = @transform_7, window_bounds = array<i64: 8, 128>}]} {
    %c0 = arith.constant 0 : index
    %c0_0 = arith.constant 0 : index
    %c0_1 = arith.constant 0 : index
    %0 = vector.load %arg1[%c0, %c0_0, %c0_1] : memref<8x16x128xbf16, #tpu.memory_space<vmem>>, vector<8x16x128xbf16>
    %1 = vector.shape_cast %0 : vector<8x16x128xbf16> to vector<128x128xbf16>
    %c0_2 = arith.constant 0 : index
    %c0_3 = arith.constant 0 : index
    %2 = vector.load %arg2[%c0_2, %c0_3] : memref<128x1536xbf16, #tpu.memory_space<vmem>>, vector<128x1536xbf16>
    %cst = arith.constant dense<0.000000e+00> : vector<128x1536xf32>
    %3 = tpu.matmul %1, %2, %cst {dimension_numbers = #tpu.dot_dimension_numbers<[1], [0], [0], [1], [0, 0, 1, 1], [], []>} : vector<128x128xbf16>, vector<128x1536xbf16>, vector<128x1536xf32> -> vector<128x1536xf32>
    %4 = vector.shape_cast %3 : vector<128x1536xf32> to vector<8x16x1536xf32>
    %c0_4 = arith.constant 0 : index
    %c0_5 = arith.constant 0 : index
    %5 = vector.load %arg3[%c0_4, %c0_5] : memref<3x128xf32, #tpu.memory_space<vmem>>, vector<3x128xf32>
    %6 = vector.extract_strided_slice %4 {offsets = [0, 0, 0], sizes = [8, 14, 128], strides = [1, 1, 1]} : vector<8x16x1536xf32> to vector<8x14x128xf32>
    %7 = vector.extract_strided_slice %4 {offsets = [0, 1, 128], sizes = [8, 14, 128], strides = [1, 1, 1]} : vector<8x16x1536xf32> to vector<8x14x128xf32>
    %8 = arith.addf %6, %7 : vector<8x14x128xf32>
    %9 = vector.extract_strided_slice %4 {offsets = [0, 2, 256], sizes = [8, 14, 128], strides = [1, 1, 1]} : vector<8x16x1536xf32> to vector<8x14x128xf32>
    %10 = arith.addf %8, %9 : vector<8x14x128xf32>
    %cst_6 = arith.constant dense<0xFF800000> : vector<8x128xf32>
    %11 = vector.multi_reduction <maximumf>, %10, %cst_6 [1] : vector<8x14x128xf32> to vector<8x128xf32>
    %12 = vector.extract_strided_slice %5 {offsets = [0, 0], sizes = [1, 128], strides = [1, 1]} : vector<3x128xf32> to vector<1x128xf32>
    %13 = vector.shape_cast %12 : vector<1x128xf32> to vector<128xf32>
    %14 = vector.shape_cast %13 : vector<128xf32> to vector<1x128xf32>
    %15 = vector.broadcast %14 : vector<1x128xf32> to vector<8x128xf32>
    %16 = arith.addf %11, %15 : vector<8x128xf32>
    %cst_7 = arith.constant 0.000000e+00 : f32
    %17 = vector.broadcast %cst_7 : f32 to vector<8x128xf32>
    %18 = arith.maximumf %16, %17 : vector<8x128xf32>
    %19 = arith.truncf %18 : vector<8x128xf32> to vector<8x128xbf16>
    %c0_8 = arith.constant 0 : index
    %c0_9 = arith.constant 0 : index
    %20 = vector.load %arg4[%c0_8, %c0_9] : memref<384x128xbf16, #tpu.memory_space<vmem>>, vector<128x128xbf16>
    %cst_10 = arith.constant dense<0.000000e+00> : vector<8x128xf32>
    %21 = tpu.matmul %19, %20, %cst_10 {dimension_numbers = #tpu.dot_dimension_numbers<[1], [0], [0], [1], [0, 0, 1, 1], [], []>} : vector<8x128xbf16>, vector<128x128xbf16>, vector<8x128xf32> -> vector<8x128xf32>
    %22 = vector.extract_strided_slice %4 {offsets = [0, 0, 384], sizes = [8, 13, 128], strides = [1, 1, 1]} : vector<8x16x1536xf32> to vector<8x13x128xf32>
    %23 = vector.extract_strided_slice %4 {offsets = [0, 1, 512], sizes = [8, 13, 128], strides = [1, 1, 1]} : vector<8x16x1536xf32> to vector<8x13x128xf32>
    %24 = arith.addf %22, %23 : vector<8x13x128xf32>
    %25 = vector.extract_strided_slice %4 {offsets = [0, 2, 640], sizes = [8, 13, 128], strides = [1, 1, 1]} : vector<8x16x1536xf32> to vector<8x13x128xf32>
    %26 = arith.addf %24, %25 : vector<8x13x128xf32>
    %27 = vector.extract_strided_slice %4 {offsets = [0, 3, 768], sizes = [8, 13, 128], strides = [1, 1, 1]} : vector<8x16x1536xf32> to vector<8x13x128xf32>
    %28 = arith.addf %26, %27 : vector<8x13x128xf32>
    %cst_11 = arith.constant dense<0xFF800000> : vector<8x128xf32>
    %29 = vector.multi_reduction <maximumf>, %28, %cst_11 [1] : vector<8x13x128xf32> to vector<8x128xf32>
    %30 = vector.extract_strided_slice %5 {offsets = [1, 0], sizes = [1, 128], strides = [1, 1]} : vector<3x128xf32> to vector<1x128xf32>
    %31 = vector.shape_cast %30 : vector<1x128xf32> to vector<128xf32>
    %32 = vector.shape_cast %31 : vector<128xf32> to vector<1x128xf32>
    %33 = vector.broadcast %32 : vector<1x128xf32> to vector<8x128xf32>
    %34 = arith.addf %29, %33 : vector<8x128xf32>
    %cst_12 = arith.constant 0.000000e+00 : f32
    %35 = vector.broadcast %cst_12 : f32 to vector<8x128xf32>
    %36 = arith.maximumf %34, %35 : vector<8x128xf32>
    %37 = arith.truncf %36 : vector<8x128xf32> to vector<8x128xbf16>
    %c128 = arith.constant 128 : index
    %c0_13 = arith.constant 0 : index
    %38 = vector.load %arg4[%c128, %c0_13] : memref<384x128xbf16, #tpu.memory_space<vmem>>, vector<128x128xbf16>
    %cst_14 = arith.constant dense<0.000000e+00> : vector<8x128xf32>
    %39 = tpu.matmul %37, %38, %cst_14 {dimension_numbers = #tpu.dot_dimension_numbers<[1], [0], [0], [1], [0, 0, 1, 1], [], []>} : vector<8x128xbf16>, vector<128x128xbf16>, vector<8x128xf32> -> vector<8x128xf32>
    %40 = arith.addf %21, %39 : vector<8x128xf32>
    %41 = vector.extract_strided_slice %4 {offsets = [0, 0, 896], sizes = [8, 12, 128], strides = [1, 1, 1]} : vector<8x16x1536xf32> to vector<8x12x128xf32>
    %42 = vector.extract_strided_slice %4 {offsets = [0, 1, 1024], sizes = [8, 12, 128], strides = [1, 1, 1]} : vector<8x16x1536xf32> to vector<8x12x128xf32>
    %43 = arith.addf %41, %42 : vector<8x12x128xf32>
    %44 = vector.extract_strided_slice %4 {offsets = [0, 2, 1152], sizes = [8, 12, 128], strides = [1, 1, 1]} : vector<8x16x1536xf32> to vector<8x12x128xf32>
    %45 = arith.addf %43, %44 : vector<8x12x128xf32>
    %46 = vector.extract_strided_slice %4 {offsets = [0, 3, 1280], sizes = [8, 12, 128], strides = [1, 1, 1]} : vector<8x16x1536xf32> to vector<8x12x128xf32>
    %47 = arith.addf %45, %46 : vector<8x12x128xf32>
    %48 = vector.extract_strided_slice %4 {offsets = [0, 4, 1408], sizes = [8, 12, 128], strides = [1, 1, 1]} : vector<8x16x1536xf32> to vector<8x12x128xf32>
    %49 = arith.addf %47, %48 : vector<8x12x128xf32>
    %cst_15 = arith.constant dense<0xFF800000> : vector<8x128xf32>
    %50 = vector.multi_reduction <maximumf>, %49, %cst_15 [1] : vector<8x12x128xf32> to vector<8x128xf32>
    %51 = vector.extract_strided_slice %5 {offsets = [2, 0], sizes = [1, 128], strides = [1, 1]} : vector<3x128xf32> to vector<1x128xf32>
    %52 = vector.shape_cast %51 : vector<1x128xf32> to vector<128xf32>
    %53 = vector.shape_cast %52 : vector<128xf32> to vector<1x128xf32>
    %54 = vector.broadcast %53 : vector<1x128xf32> to vector<8x128xf32>
    %55 = arith.addf %50, %54 : vector<8x128xf32>
    %cst_16 = arith.constant 0.000000e+00 : f32
    %56 = vector.broadcast %cst_16 : f32 to vector<8x128xf32>
    %57 = arith.maximumf %55, %56 : vector<8x128xf32>
    %58 = arith.truncf %57 : vector<8x128xf32> to vector<8x128xbf16>
    %c256 = arith.constant 256 : index
    %c0_17 = arith.constant 0 : index
    %59 = vector.load %arg4[%c256, %c0_17] : memref<384x128xbf16, #tpu.memory_space<vmem>>, vector<128x128xbf16>
    %cst_18 = arith.constant dense<0.000000e+00> : vector<8x128xf32>
    %60 = tpu.matmul %58, %59, %cst_18 {dimension_numbers = #tpu.dot_dimension_numbers<[1], [0], [0], [1], [0, 0, 1, 1], [], []>} : vector<8x128xbf16>, vector<128x128xbf16>, vector<8x128xf32> -> vector<8x128xf32>
    %61 = arith.addf %40, %60 : vector<8x128xf32>
    %c0_19 = arith.constant 0 : index
    %c0_20 = arith.constant 0 : index
    %62 = vector.load %arg5[%c0_19, %c0_20] : memref<1x128xf32, #tpu.memory_space<vmem>>, vector<1x128xf32>
    %63 = vector.broadcast %62 : vector<1x128xf32> to vector<8x128xf32>
    %64 = arith.addf %61, %63 : vector<8x128xf32>
    %cst_21 = arith.constant 0.000000e+00 : f32
    %65 = vector.broadcast %cst_21 : f32 to vector<8x128xf32>
    %66 = arith.maximumf %64, %65 : vector<8x128xf32>
    %67 = arith.truncf %66 : vector<8x128xf32> to vector<8x128xbf16>
    %c0_22 = arith.constant 0 : index
    %c0_23 = arith.constant 0 : index
    %68 = vector.load %arg6[%c0_22, %c0_23] : memref<128x128xbf16, #tpu.memory_space<vmem>>, vector<128x128xbf16>
    %cst_24 = arith.constant dense<0.000000e+00> : vector<8x128xf32>
    %69 = tpu.matmul %67, %68, %cst_24 {dimension_numbers = #tpu.dot_dimension_numbers<[1], [0], [0], [1], [0, 0, 1, 1], [], []>} : vector<8x128xbf16>, vector<128x128xbf16>, vector<8x128xf32> -> vector<8x128xf32>
    %c0_25 = arith.constant 0 : index
    %c0_26 = arith.constant 0 : index
    %70 = vector.load %arg7[%c0_25, %c0_26] : memref<1x128xf32, #tpu.memory_space<vmem>>, vector<1x128xf32>
    %71 = vector.broadcast %70 : vector<1x128xf32> to vector<8x128xf32>
    %72 = arith.addf %69, %71 : vector<8x128xf32>
    %c0_27 = arith.constant 0 : index
    %c0_28 = arith.constant 0 : index
    %73 = vector.load %arg8[%c0_27, %c0_28] : memref<8x128xf32, #tpu.memory_space<vmem>>, vector<8x128xf32>
    tpu.vector_store %arg8[%c0_27, %c0_28], %72 {strides = array<i32>} : memref<8x128xf32, #tpu.memory_space<vmem>>, vector<8x128xf32>,
    return
  }
  func.func @transform_0(%arg0: i32) -> (i32, i32, i32) {
    %c0_i32 = arith.constant 0 : i32
    %c0_i32_0 = arith.constant 0 : i32
    %c0_i32_1 = arith.constant 0 : i32
    return %arg0, %c0_i32, %c0_i32_0 : i32, i32, i32
  }
  func.func @transform_1(%arg0: i32) -> (i32, i32) {
    %c0_i32 = arith.constant 0 : i32
    %c0_i32_0 = arith.constant 0 : i32
    %c0_i32_1 = arith.constant 0 : i32
    return %c0_i32, %c0_i32_0 : i32, i32
  }
  func.func @transform_2(%arg0: i32) -> (i32, i32) {
    %c0_i32 = arith.constant 0 : i32
    %c0_i32_0 = arith.constant 0 : i32
    %c0_i32_1 = arith.constant 0 : i32
    return %c0_i32, %c0_i32_0 : i32, i32
  }
  func.func @transform_3(%arg0: i32) -> (i32, i32) {
    %c0_i32 = arith.constant 0 : i32
    %c0_i32_0 = arith.constant 0 : i32
    %c0_i32_1 = arith.constant 0 : i32
    return %c0_i32, %c0_i32_0 : i32, i32
  }
  func.func @transform_4(%arg0: i32) -> (i32, i32) {
    %c0_i32 = arith.constant 0 : i32
    %c0_i32_0 = arith.constant 0 : i32
    %c0_i32_1 = arith.constant 0 : i32
    return %c0_i32, %c0_i32_0 : i32, i32
  }
  func.func @transform_5(%arg0: i32) -> (i32, i32) {
    %c0_i32 = arith.constant 0 : i32
    %c0_i32_0 = arith.constant 0 : i32
    %c0_i32_1 = arith.constant 0 : i32
    return %c0_i32, %c0_i32_0 : i32, i32
  }
  func.func @transform_6(%arg0: i32) -> (i32, i32) {
    %c0_i32 = arith.constant 0 : i32
    %c0_i32_0 = arith.constant 0 : i32
    %c0_i32_1 = arith.constant 0 : i32
    return %c0_i32, %c0_i32_0 : i32, i32
  }
  func.func @transform_7(%arg0: i32) -> (i32, i32) {
    %c0_i32 = arith.constant 0 : i32
    %c0_i32_0 = arith.constant 0 : i32
    return %arg0, %c0_i32 : i32, i32
  }
}

</mosaic_0001>

<bundles_post_ra>
// kernel: tpu_custom_call.1
= control target key start
LH: loop header
LB: loop body
LE: loop exit
PB: predicated region body
PF: predicated region fallthrough
CT: control target
= control target key end

     0   :  { %s4747_s0 = inlined_call_operand.hbm [shape: bf16[16,16,128], index: 0, kind: input, shape index: {}]   ;;  %s4748_s1 = inlined_call_operand.hbm [shape: bf16[128,1536], index: 1, kind: input, shape index: {}]   ;;  %s4749_s2 = inlined_call_operand.hbm [shape: f32[3,128], index: 2, kind: input, shape index: {}]   ;;  %s4750_s3 = inlined_call_operand.hbm [shape: bf16[384,128], index: 3, kind: input, shape index: {}]   ;;  %s4751_s4 = inlined_call_operand.vmem [shape: f32[1,128], index: 4, kind: input, shape index: {}]   ;;  %s4752_s5 = inlined_call_operand.hbm [shape: bf16[128,128], index: 5, kind: input, shape index: {}]   ;;  %s4753_s6 = inlined_call_operand.vmem [shape: f32[1,128], index: 6, kind: input, shape index: {}]   ;;  %s4754_s7 = inlined_call_operand.hbm [shape: f32[16,128], index: 7, kind: output, shape index: {}]  }
   0x1   :  { %4761 = sst [smem:[#allocation16_spill]] %s4748_s1 }
   0x2   :  { %12 = vsyncpa [#allocation3], 0 }
   0x3   :  { %14 = vsyncpa [#allocation3 + $0x1], 0 }
   0x4   :  { %15 = vsyncpa [#allocation6], 0 }
   0x5   :  { %16 = vsyncpa [#allocation9], 0 }
   0x6   :  { %17 = vsyncpa [#allocation4], 0 }
   0x7   :  { %19 = vsyncpa [#allocation4 + $0x1], 0  ;;  %s4078_s24 = smov 0   ;;  %s4080_s25 = smov 0  }
   0x8   :  { %s4082_s26 = smov 0   ;;  %s4084_s27 = smov 0  }
   0x9 LB: > { %s4099_s28 = sadd.s32 4294967295, %s4023_s27   ;;  %s3263_s29 = sadd.s32 4294967294, %s4023_s27   ;;  %s4023_s27 = sphi %s4084_s27, %s4784_s27   ;;  %s4019_s26 = sphi %s4082_s26, %s4783_s26   ;;  %s4015_s25 = sphi %s4080_s25, %s4782_s25   ;;  %s4011_s24 = sphi %s4078_s24, %s4781_s24  }
   0xa   : > { %p45_p0 = scmp.ne.s32.totalorder %s4015_s25, %s4011_s24  ;;  %p4755_p1 = scmp.eq.s32.totalorder %s4099_s28, 0 }
   0xb   : > { %p201_p3 = scmp.eq.s32.totalorder %s3263_s29, 1  ;;  %p3264_p5 = scmp.ge.s32.totalorder %s4023_s27, 1 }
   0xc   : > { %p4108_p4 = por %p4755_p1, %p45_p0  ;;  %p208_p7 = scmp.lt.s32.totalorder %s4023_s27, 3 }
   0xd   : > { %p4113_p6 = por %p201_p3, %p45_p0  ;;  %s4025_s10 = smov [#allocation5]  }
   0xe   : > { %s4762_s30 = scalar_select %p4108_p4, 1, 0 }
   0xf   : > { %s4763_s8 = scalar_select %p4113_p6, 1, 0 }
  0x10   : > { %p4118_p8 = pnand %p3264_p5, %p208_p7  ;;  %s220_s11 = sshll.u32 %s4025_s10, 4  ;;  %s221_s11 = int_to_ptr.vmem [resolvable:$true] %s220_s11 }
  0x11   : > { %s4026_s13 = smov [#allocation8]   ;;  %s3830_s15 = scalar_lea.vmem %s221_s11, 12288 }
  0x12   : > { %s4764_s9 = scalar_select %p4118_p8, 1, 0 }
  0x13   : > { %p3561_p9 = pneg %p4118_p8  ;;  %s244_s14 = sshll.u32 %s4026_s13, 4  ;;  %s245_s14 = int_to_ptr.vmem [resolvable:$true] %s244_s14 }
  0x14   : > { %p3831_p13 = scmp.ne.s32.totalorder %s221_s11, %s3830_s15  ;;  %p3838_p5 = scmp.lt.s32.totalorder %s221_s11, %s221_s11 }
  0x15   : > { %p4127_p11 = pnand %p3561_p9, %p4755_p1  ;;  %p3839_p7 = scmp.lt.s32.totalorder %s3830_s15, %s3830_s15 }
  0x17   : > { %p3821_p12 = pneg %p4127_p11  ;;  %p3840_p10 = por %p3839_p7, %p3838_p5 }
  0x19   : > { %p3833_p0 = pnand %p3831_p13, %p3821_p12 }
  0x1b   : > { %p3834_p3 = pneg %p3833_p0 }
  0x1d   : > { %p3841_p9 = pnand %p3840_p10, %p3834_p3 }
  0x1f   : > { %3844 = shalt.err (!%p3841_p9)
}
  0x20   : > { %s4027_s16 = smov 768   ;;  %s4028_s17 = smov 48  }
  0x21   : > { %s4766_s1 = sld [smem:[#allocation16_spill]]  ;;  %s3856_s20 = scalar_lea.vmem %s245_s14, 3072 }
  0x22   : > { %p3857_p1 = scmp.ne.s32.totalorder %s245_s14, %s3856_s20  ;;  %p3864_p2 = scmp.lt.s32.totalorder %s245_s14, %s245_s14 }
  0x23   : > { %p3865_p6 = scmp.lt.s32.totalorder %s3856_s20, %s3856_s20 }
  0x24   : > { %p3859_p13 = pnand %p3857_p1, %p3821_p12 }
  0x25   : > { %p3866_p5 = por %p3865_p6, %p3864_p2 }
  0x26   : > { %p3860_p0 = pneg %p3859_p13 }
  0x27   : > { %3564 = dma.hbm_to_vmem [thread:$0]  (!%p4127_p11), %s4766_s1, 12288, %s221_s11, [#allocation6], %s4027_s16, %s4027_s16, %s4028_s17  }
  0x28   : > { %p3867_p10 = pnand %p3866_p5, %p3860_p0 }
  0x2a   : > { %3870 = shalt.err (!%p3867_p10)
}
  0x2b   : > { %s4758_s21 = smov 64   ;;  %s4759_s22 = smov 4  }
  0x2c   : > { %3570 = dma.hbm_to_vmem [thread:$0]  (!%p4127_p11), %s4750_s3, 3072, %s245_s14, [#allocation9], %s4758_s21, %s4758_s21, %s4759_s22  }
  0x2d   : > { %s4031_s10 = smov [#allocation7]   ;;  %s4032_s13 = smov [#allocation10]  }
  0x2e   : > { %s234_s11 = sshll.u32 %s4031_s10, 4  ;;  %s260_s15 = sshll.u32 %s4032_s13, 4  ;;  %s235_s11 = int_to_ptr.vmem [resolvable:$true] %s234_s11  ;;  %s261_s15 = int_to_ptr.vmem [resolvable:$true] %s260_s15 }
  0x2f   : > { %s3882_s16 = scalar_lea.vmem %s235_s11, 64  ;;  %p3890_p3 = scmp.lt.s32.totalorder %s235_s11, %s235_s11 }
  0x30   : > { %p3883_p1 = scmp.ne.s32.totalorder %s235_s11, %s3882_s16  ;;  %p3891_p7 = scmp.lt.s32.totalorder %s3882_s16, %s3882_s16 }
  0x32   : > { %p3885_p2 = pnand %p3883_p1, %p3821_p12  ;;  %p3892_p9 = por %p3891_p7, %p3890_p3 }
  0x34   : > { %p3886_p6 = pneg %p3885_p2 }
  0x36   : > { %p3893_p13 = pnand %p3892_p9, %p3886_p6 }
  0x38   : > { %3896 = shalt.err (!%p3893_p13)
}
  0x39   : > { %3567 = dma.hbm_to_vmem [thread:$0]  (!%p4127_p11), %s4749_s2, 64, %s235_s11, [#allocation6]  }
  0x3a   : > { %s3908_s18 = scalar_lea.vmem %s261_s15, 1024  ;;  %p3916_p1 = scmp.lt.s32.totalorder %s261_s15, %s261_s15 }
  0x3b   : > { %p3909_p0 = scmp.ne.s32.totalorder %s261_s15, %s3908_s18  ;;  %p3917_p2 = scmp.lt.s32.totalorder %s3908_s18, %s3908_s18 }
  0x3d   : > { %p3911_p5 = pnand %p3909_p0, %p3821_p12  ;;  %p3918_p4 = por %p3917_p2, %p3916_p1 }
  0x3f   : > { %p3912_p10 = pneg %p3911_p5 }
  0x41   : > { %p3919_p8 = pnand %p3918_p4, %p3912_p10 }
  0x43   : > { %3922 = shalt.err (!%p3919_p8)
}
  0x44   : > { %3573 = dma.hbm_to_vmem [thread:$0]  (!%p4127_p11), %s4752_s5, 1024, %s261_s15, [#allocation9], %s4758_s21, %s4758_s21, %s4759_s22  }
  0x45   : > { %s4172_s23 = sadd.s32 1, %s4023_s27   ;;  %s32_s29 = sadd.s32 1, %s4019_s26 }
  0x46   : > { %s29_s12 = ssub.s32 %s4023_s27, %s4172_s23  ;;  %p39_p8 = scmp.ne.s32.totalorder %s4019_s26, %s4015_s25 }
  0x47   : > { %p30_p4 = scmp.eq.s32.totalorder %s29_s12, 0  ;;  %p40_p12 = scmp.eq.s32.totalorder %s4023_s27, 0 }
  0x48   : > { %p4767_p3 = scmp.eq.s32.totalorder %s4099_s28, 1  ;;  %p3586_p9 = scmp.lt.s32.totalorder %s4023_s27, 2 }
  0x49   : > { %s4181_s10 = scalar_select %p30_p4, %s4019_s26, %s32_s29  }
  0x4a   : > { %p41_p6 = por %p40_p12, %p39_p8  ;;  %p4185_p7 = por %p4767_p3, %p39_p8 }
  0x4b   : > { %s277_s13 = sand.u32 1, %s4019_s26   ;;  %s3424_s15 = sshll.u32 %s4023_s27, 10 }
  0x4c   : > { %s4768_s11 = scalar_select %p4185_p7, 1, 0 }
  0x4d   : > { %s3270_s16 = sshll.u32 %s277_s13, 6  ;;  %s4195_s18 = scalar_lea.hbm %s4747_s0, %s3424_s15 }
  0x4e   : > { %s281_s19 = scalar_lea.vmem [#allocation2], %s3270_s16  ;;  %p4199_p11 = pnand %p3586_p9, %p41_p6 }
  0x4f   : > { %s289_s20 = sshll.u32 %s281_s19, 4  ;;  %s4203_s29 = scalar_lea.sflag [#allocation3], %s277_s13  ;;  %s4197_s20 = int_to_ptr.vmem [resolvable:$true] %s289_s20 }
  0x50   : > { %s3923_s21 = scalar_lea.hbm %s4195_s18, 1024  ;;  %p3925_p0 = pneg %p4199_p11 }
  0x51   : > { %p3924_p13 = scmp.ne.s32.totalorder %s4195_s18, %s3923_s21  ;;  %s3928_s16 = scalar_lea.hbm %s4747_s0, 2048 }
  0x52   : > { %p3929_p1 = scmp.lt.s32.totalorder %s4195_s18, %s4747_s0  ;;  %p3930_p2 = scmp.lt.s32.totalorder %s3928_s16, %s3923_s21 }
  0x53   : > { %p3926_p5 = pnand %p3925_p0, %p3924_p13 }
  0x54   : > { %p3931_p4 = por %p3930_p2, %p3929_p1 }
  0x55   : > { %p3927_p10 = pneg %p3926_p5 }
  0x57   : > { %p3932_p8 = pnand %p3931_p4, %p3927_p10 }
  0x59   : > { %3935 = shalt.err (!%p3932_p8)
}
  0x5a   : > { %s3936_s13 = scalar_lea.vmem %s4197_s20, 1024  ;;  %s4033_s22 = smov [#allocation2]  }
  0x5b   : > { %p3937_p12 = scmp.ne.s32.totalorder %s4197_s20, %s3936_s13  ;;  %s3941_s1 = sshll.u32 %s4033_s22, 4  ;;  %s3942_s1 = int_to_ptr.vmem [resolvable:$false] %s3941_s1 }
  0x5c   : > { %s3943_s15 = scalar_lea.vmem %s3942_s1, 2048  ;;  %p3944_p9 = scmp.lt.s32.totalorder %s4197_s20, %s3942_s1 }
  0x5d   : > { %p3939_p6 = pnand %p3937_p12, %p3925_p0  ;;  %p3945_p13 = scmp.lt.s32.totalorder %s3943_s15, %s3936_s13 }
  0x5f   : > { %p3940_p3 = pneg %p3939_p6  ;;  %p3946_p5 = por %p3945_p13, %p3944_p9 }
  0x61   : > { %p3947_p7 = pnand %p3946_p5, %p3940_p3 }
  0x63   : > { %3950 = shalt.err (!%p3947_p7)
}
  0x64   : > { %s4770_s21 = smov 4   ;;  %s4771_s14 = smov 64  }
  0x65   : > { %3577 = dma.hbm_to_vmem [thread:$0]  (!%p4199_p11), %s4195_s18, 1024, %s4197_s20, %s4203_s29, %s4771_s14, %s4771_s14, %s4770_s21  }
  0x66   : > { %p4772_p0 = scmp.ne.s32.totalorder %s4764_s9, 0 }
  0x67   : > { %s4230_s22 = sand.u32 (!%p4772_p0), 1, %s4015_s25   ;;  %p4773_p7 = scmp.ne.s32.totalorder (!%p4772_p0), %s4762_s30, 0 }
  0x68   : > { %301 = sbr.rel (%p4772_p0) target bundleno = 981 (0x3d5), region = 48  ;;  %s3275_s1 = sshll.u32 (!%p4772_p0), %s4230_s22, 6 }
  0x69   : > { %s304_s16 = scalar_lea.sflag (!%p4772_p0), [#allocation3], %s4230_s22  ;;  %s4234_s17 = scalar_lea.vmem (!%p4772_p0), [#allocation2], %s3275_s1 }
  0x6d   : > { %3994 = dma.done.wait (%p4773_p7), %s304_s16, 1024  }
  0x6e   : > { %3996 = vsyncadd (%p4773_p7), %s304_s16, 4294966272  ;;  %p4774_p11 = scmp.eq.s32.totalorder %s4099_s28, 0 }
  0x70   : > { %3998 = dma.done.wait (%p4774_p11), [#allocation6], 12352   ;;  %p4775_p10 = pmov %p4774_p11 }
  0x72   : > { %4000 = vsyncadd (%p4775_p10), [#allocation6], 4294954944  ;;  %p4776_p1 = pmov %p4775_p10 }
  0x74   : > { %4002 = dma.done.wait (%p4776_p1), [#allocation9], 4096   ;;  %p4777_p2 = pmov %p4776_p1 }
  0x75   : > { %v4034_v0 = vmov 0   ;;  %v3635_v1 = vld [vmem:[#allocation5 + $0x2a4] ss:$48 sps:$4 sm:$0xff]   ;;  %v3637_v2 = vld [vmem:[#allocation5 + $0x2ac] ss:$48 sps:$4 sm:$0xff]   ;;  %vm4036_vm0 = vmmov 0  }
  0x76   : > { %4004 = vsyncadd (%p4777_p2), [#allocation9], 4294963200  ;;  %1028 = vmatprep.mubr.bf16.mxu0 %v4034_v0  ;;  %1141 = vmatprep.mubr.bf16.mxu1 %v4034_v0  ;;  %v3639_v3 = vld [vmem:[#allocation5 + $0x2a0] ss:$48 sps:$4 sm:$0xff]   ;;  %v3640_v4 = vld [vmem:[#allocation5 + $0x2a8] ss:$48 sps:$4 sm:$0xff]  }
  0x77   : > { %996 = vmatprep.subr.bf16.mxu0 %v3635_v1  ;;  %1109 = vmatprep.subr.bf16.mxu1 %v3637_v2  ;;  %v3641_v5 = vld [vmem:[#allocation5 + $0x244] ss:$48 sps:$4 sm:$0xff]   ;;  %v3643_v6 = vld [vmem:[#allocation5 + $0x24c] ss:$48 sps:$4 sm:$0xff]   ;;  %v3645_v7 = vld [vmem:[#allocation5 + $0x240] ss:$48 sps:$4 sm:$0xff]  }
  0x78   : > { %997 = vmatpush1.bf16.msra.mxu0 %v3639_v3  ;;  %1110 = vmatpush1.bf16.msra.mxu1 %v3640_v4  ;;  %v3646_v8 = vld [vmem:[#allocation5 + $0x248] ss:$48 sps:$4 sm:$0xff]   ;;  %v3647_v9 = vld [vmem:[#allocation5 + $0x1e4] ss:$48 sps:$4 sm:$0xff]   ;;  %v3649_v10 = vld [vmem:[#allocation5 + $0x1ec] ss:$48 sps:$4 sm:$0xff]  }
  0x79   : > { %998 = vmatprep.subr.bf16.mxu0 %v3641_v5  ;;  %1111 = vmatprep.subr.bf16.mxu1 %v3643_v6  ;;  %v3651_v11 = vld [vmem:[#allocation5 + $0x1e0] ss:$48 sps:$4 sm:$0xff]   ;;  %v3652_v12 = vld [vmem:[#allocation5 + $0x1e8] ss:$48 sps:$4 sm:$0xff]   ;;  %v3653_v13 = vld [vmem:[#allocation5 + $0x184] ss:$48 sps:$4 sm:$0xff]  }
  0x7a   : > { %v3655_v14 = vld [vmem:[#allocation5 + $0x18c] ss:$48 sps:$4 sm:$0xff]   ;;  %v3657_v15 = vld [vmem:[#allocation5 + $0x180] ss:$48 sps:$4 sm:$0xff]   ;;  %v3658_v16 = vld [vmem:[#allocation5 + $0x188] ss:$48 sps:$4 sm:$0xff]  }
  0x7b   : > { %v3659_v17 = vld [vmem:[#allocation5 + $0x124] ss:$48 sps:$4 sm:$0xff]   ;;  %v3661_v18 = vld [vmem:[#allocation5 + $0x12c] ss:$48 sps:$4 sm:$0xff]   ;;  %v3663_v19 = vld [vmem:[#allocation5 + $0x120] ss:$48 sps:$4 sm:$0xff]  }
  0x7c   : > { %999 = vmatpush1.bf16.msra.mxu0 %v3645_v7  ;;  %1112 = vmatpush1.bf16.msra.mxu1 %v3646_v8  ;;  %v3664_v20 = vld [vmem:[#allocation5 + $0x128] ss:$48 sps:$4 sm:$0xff]   ;;  %v3665_v21 = vld [vmem:[#allocation5 + $0xc4] ss:$48 sps:$4 sm:$0xff]   ;;  %v3667_v22 = vld [vmem:[#allocation5 + $0xcc] ss:$48 sps:$4 sm:$0xff]  }
  0x7d   : > { %1000 = vmatprep.subr.bf16.mxu0 %v3647_v9  ;;  %1113 = vmatprep.subr.bf16.mxu1 %v3649_v10  ;;  %v3669_v23 = vld [vmem:[#allocation5 + $0xc0] ss:$48 sps:$4 sm:$0xff]   ;;  %v3670_v24 = vld [vmem:[#allocation5 + $0xc8] ss:$48 sps:$4 sm:$0xff]   ;;  %v3671_v25 = vld [vmem:[#allocation5 + $0x64] ss:$48 sps:$4 sm:$0xff]  }
  0x7e   : > { %v3673_v26 = vld [vmem:[#allocation5 + $0x6c] ss:$48 sps:$4 sm:$0xff]   ;;  %v3675_v27 = vld [vmem:[#allocation5 + $0x60] ss:$48 sps:$4 sm:$0xff]   ;;  %v3676_v28 = vld [vmem:[#allocation5 + $0x68] ss:$48 sps:$4 sm:$0xff]  }
  0x7f   : > { %v3677_v29 = vld [vmem:[#allocation5 + $0x4] ss:$48 sps:$4 sm:$0xff]   ;;  %v3679_v30 = vld [vmem:[#allocation5 + $0xc] ss:$48 sps:$4 sm:$0xff]   ;;  %v3681_v31 = vld [vmem:[#allocation5] ss:$48 sps:$4 sm:$0xff]  }
  0x80   : > { %1001 = vmatpush1.bf16.msra.mxu0 %v3651_v11  ;;  %1114 = vmatpush1.bf16.msra.mxu1 %v3652_v12  ;;  %v3682_v32 = vld [vmem:[#allocation5 + $0x8] ss:$48 sps:$4 sm:$0xff]   ;;  %v3686_v33 = vld [vmem:[#allocation5 + $0x2b4] ss:$48 sps:$4 sm:$0xff]   ;;  %v3689_v34 = vld [vmem:[#allocation5 + $0x2bc] ss:$48 sps:$4 sm:$0xff]  }
  0x81   : > { %1002 = vmatprep.subr.bf16.mxu0 %v3653_v13  ;;  %1115 = vmatprep.subr.bf16.mxu1 %v3655_v14  ;;  %v4251_v35 = vld [vmem:[%s4234_s17] sm:$0xff]   ;;  %v3687_v37 = vld [vmem:[#allocation5 + $0x2b8] ss:$48 sps:$4 sm:$0xff]   ;;  %v3696_v39 = vld [vmem:[#allocation5 + $0x25c] ss:$48 sps:$4 sm:$0xff]   ;;  %vm1691_vm1 = vcmask 1046528  }
  0x82   : > { %v3684_v36 = vld [vmem:[#allocation5 + $0x2b0] ss:$48 sps:$4 sm:$0xff]   ;;  %v3693_v38 = vld [vmem:[#allocation5 + $0x254] ss:$48 sps:$4 sm:$0xff]   ;;  %v3694_v41 = vld [vmem:[#allocation5 + $0x258] ss:$48 sps:$4 sm:$0xff]  }
  0x83   : > { %v3691_v40 = vld [vmem:[#allocation5 + $0x250] ss:$48 sps:$4 sm:$0xff]   ;;  %v3700_v42 = vld [vmem:[#allocation5 + $0x1f4] ss:$48 sps:$4 sm:$0xff]   ;;  %v3703_v43 = vld [vmem:[#allocation5 + $0x1fc] ss:$48 sps:$4 sm:$0xff]  }
  0x84   : > { %1003 = vmatpush1.bf16.msra.mxu0 %v3657_v15  ;;  %1116 = vmatpush1.bf16.msra.mxu1 %v3658_v16  ;;  %v4258_v44 = vld [vmem:[%s4234_s17 + $0x8] sm:$0xff]   ;;  %v3698_v45 = vld [vmem:[#allocation5 + $0x1f0] ss:$48 sps:$4 sm:$0xff]   ;;  %v3707_v47 = vld [vmem:[#allocation5 + $0x194] ss:$48 sps:$4 sm:$0xff]   ;;  %vm1764_vm2 = vcmask 1045504  }
  0x85   : > { %1004 = vmatprep.subr.bf16.mxu0 %v3659_v17  ;;  %1117 = vmatprep.subr.bf16.mxu1 %v3661_v18  ;;  %v3701_v46 = vld [vmem:[#allocation5 + $0x1f8] ss:$48 sps:$4 sm:$0xff]   ;;  %v3710_v48 = vld [vmem:[#allocation5 + $0x19c] ss:$48 sps:$4 sm:$0xff]   ;;  %v3705_v49 = vld [vmem:[#allocation5 + $0x190] ss:$48 sps:$4 sm:$0xff]  }
  0x86   : > { %v3708_v50 = vld [vmem:[#allocation5 + $0x198] ss:$48 sps:$4 sm:$0xff]   ;;  %v3714_v51 = vld [vmem:[#allocation5 + $0x134] ss:$48 sps:$4 sm:$0xff]   ;;  %v3717_v52 = vld [vmem:[#allocation5 + $0x13c] ss:$48 sps:$4 sm:$0xff]  }
  0x87   : > { %v4265_v53 = vld [vmem:[%s4234_s17 + $0x10] sm:$0xff]   ;;  %v3715_v55 = vld [vmem:[#allocation5 + $0x138] ss:$48 sps:$4 sm:$0xff]   ;;  %v3724_v57 = vld [vmem:[#allocation5 + $0xdc] ss:$48 sps:$4 sm:$0xff]   ;;  %vm2271_vm3 = vcmask 1041409  }
  0x88   : > { %1005 = vmatpush1.bf16.msra.mxu0 %v3663_v19  ;;  %1118 = vmatpush1.bf16.msra.mxu1 %v3664_v20  ;;  %v3712_v54 = vld [vmem:[#allocation5 + $0x130] ss:$48 sps:$4 sm:$0xff]   ;;  %v3721_v56 = vld [vmem:[#allocation5 + $0xd4] ss:$48 sps:$4 sm:$0xff]   ;;  %v3722_v59 = vld [vmem:[#allocation5 + $0xd8] ss:$48 sps:$4 sm:$0xff]  }
  0x89   : > { %1006 = vmatprep.subr.bf16.mxu0 %v3665_v21  ;;  %1119 = vmatprep.subr.bf16.mxu1 %v3667_v22  ;;  %v3719_v58 = vld [vmem:[#allocation5 + $0xd0] ss:$48 sps:$4 sm:$0xff]   ;;  %v3728_v60 = vld [vmem:[#allocation5 + $0x74] ss:$48 sps:$4 sm:$0xff]   ;;  %v3731_v61 = vld [vmem:[#allocation5 + $0x7c] ss:$48 sps:$4 sm:$0xff]  }
  0x8a   : > { %v4272_v62 = vld [vmem:[%s4234_s17 + $0x18] sm:$0xff]   ;;  %v3726_v63 = vld [vmem:[#allocation5 + $0x70] ss:$48 sps:$4 sm:$0xff]   ;;  %v3735_v2 = vld [vmem:[#allocation5 + $0x14] ss:$48 sps:$4 sm:$0xff]   ;;  %vm2274_vm4 = vcmask 1042434  }
  0x8b   : > { %v3729_v1 = vld [vmem:[#allocation5 + $0x78] ss:$48 sps:$4 sm:$0xff]   ;;  %v3738_v3 = vld [vmem:[#allocation5 + $0x1c] ss:$48 sps:$4 sm:$0xff]   ;;  %v3733_v4 = vld [vmem:[#allocation5 + $0x10] ss:$48 sps:$4 sm:$0xff]  }
  0x8c   : > { %1007 = vmatpush1.bf16.msra.mxu0 %v3669_v23  ;;  %1120 = vmatpush1.bf16.msra.mxu1 %v3670_v24  ;;  %v3736_v5 = vld [vmem:[#allocation5 + $0x18] ss:$48 sps:$4 sm:$0xff]   ;;  %v3741_v6 = vld [vmem:[#allocation5 + $0x2c4] ss:$48 sps:$4 sm:$0xff]   ;;  %v3744_v7 = vld [vmem:[#allocation5 + $0x2cc] ss:$48 sps:$4 sm:$0xff]  }
  0x8d   : > { %1008 = vmatprep.subr.bf16.mxu0 %v3671_v25  ;;  %1121 = vmatprep.subr.bf16.mxu1 %v3673_v26  ;;  %v4279_v8 = vld [vmem:[%s4234_s17 + $0x20] sm:$0xff]   ;;  %v4286_v9 = vld [vmem:[%s4234_s17 + $0x28] sm:$0xff]   ;;  %v4293_v10 = vld [vmem:[%s4234_s17 + $0x30] sm:$0xff]   ;;  %vm2089_vm5 = vcmask 1044480   ;;  %vm2277_vm6 = vcmask 1043459   ;;  %vm2280_vm7 = vcmask 1044484  }
  0x8e   : > { %v4300_v11 = vld [vmem:[%s4234_s17 + $0x38] sm:$0xff]   ;;  %v3739_v12 = vld [vmem:[#allocation5 + $0x2c0] ss:$48 sps:$4 sm:$0xff]   ;;  %v3747_v14 = vld [vmem:[#allocation5 + $0x264] ss:$48 sps:$4 sm:$0xff]   ;;  %vm2283_vm8 = vcmask 1045509  }
  0x8f   : > { %v3742_v13 = vld [vmem:[#allocation5 + $0x2c8] ss:$48 sps:$4 sm:$0xff]   ;;  %v3750_v15 = vld [vmem:[#allocation5 + $0x26c] ss:$48 sps:$4 sm:$0xff]   ;;  %v3745_v16 = vld [vmem:[#allocation5 + $0x260] ss:$48 sps:$4 sm:$0xff]  }
  0x90   : > { %1009 = vmatpush1.bf16.msra.mxu0 %v3675_v27  ;;  %1122 = vmatpush1.bf16.msra.mxu1 %v3676_v28  ;;  %v3748_v17 = vld [vmem:[#allocation5 + $0x268] ss:$48 sps:$4 sm:$0xff]   ;;  %v3753_v18 = vld [vmem:[#allocation5 + $0x204] ss:$48 sps:$4 sm:$0xff]   ;;  %v3756_v19 = vld [vmem:[#allocation5 + $0x20c] ss:$48 sps:$4 sm:$0xff]  }
  0x91   : > { %1010 = vmatprep.subr.bf16.mxu0 %v3677_v29  ;;  %1123 = vmatprep.subr.bf16.mxu1 %v3679_v30  ;;  %v3751_v20 = vld [vmem:[#allocation5 + $0x200] ss:$48 sps:$4 sm:$0xff]   ;;  %v3754_v21 = vld [vmem:[#allocation5 + $0x208] ss:$48 sps:$4 sm:$0xff]   ;;  %v3759_v22 = vld [vmem:[#allocation5 + $0x1a4] ss:$48 sps:$4 sm:$0xff]  }
  0x92   : > { %v3762_v23 = vld [vmem:[#allocation5 + $0x1ac] ss:$48 sps:$4 sm:$0xff]   ;;  %v3757_v24 = vld [vmem:[#allocation5 + $0x1a0] ss:$48 sps:$4 sm:$0xff]   ;;  %v3760_v25 = vld [vmem:[#allocation5 + $0x1a8] ss:$48 sps:$4 sm:$0xff]  }
  0x93   : > { %v3765_v26 = vld [vmem:[#allocation5 + $0x144] ss:$48 sps:$4 sm:$0xff]   ;;  %v3768_v27 = vld [vmem:[#allocation5 + $0x14c] ss:$48 sps:$4 sm:$0xff]   ;;  %v3763_v28 = vld [vmem:[#allocation5 + $0x140] ss:$48 sps:$4 sm:$0xff]  }
  0x94   : > { %1011 = vmatpush1.bf16.msra.mxu0 %v3681_v31  ;;  %1124 = vmatpush1.bf16.msra.mxu1 %v3682_v32  ;;  %v3766_v29 = vld [vmem:[#allocation5 + $0x148] ss:$48 sps:$4 sm:$0xff]   ;;  %v3771_v30 = vld [vmem:[#allocation5 + $0xe4] ss:$48 sps:$4 sm:$0xff]   ;;  %v3774_v31 = vld [vmem:[#allocation5 + $0xec] ss:$48 sps:$4 sm:$0xff]  }
  0x95   : > { %1222 = vmatprep.subr.bf16.mxu0 %v3686_v33  ;;  %1335 = vmatprep.subr.bf16.mxu1 %v3689_v34  ;;  %v3769_v32 = vld [vmem:[#allocation5 + $0xe0] ss:$48 sps:$4 sm:$0xff]   ;;  %v3772_v33 = vld [vmem:[#allocation5 + $0xe8] ss:$48 sps:$4 sm:$0xff]   ;;  %v3777_v34 = vld [vmem:[#allocation5 + $0x84] ss:$48 sps:$4 sm:$0xff]  }
  0x96   : > { %vm2286_vm9 = vcmask 1046534   ;;  %vm2289_vm10 = vcmask 1047559   ;;  %vm2733_vm11 = vcmask 1043456   ;;  %s3280_s18 = sshll.u32 %s4230_s22, 3  ;;  %s3420_s29 = sshll.u32 %s4099_s28, 7 }
  0x97   : > { %1029 = vmatmul.mubr.bf16.vlgmr.msra.gmra.mxu0 %v4251_v35  ;;  %1142 = vmatmul.mubr.bf16.vlgmr.msra.gmra.mxu1 %v4251_v35  ;;  %s353_s19 = scalar_lea.vmem [#allocation11], %s3280_s18  ;;  %s4704_s14 = scalar_lea.hbm %s4754_s7, %s3420_s29 }
  0x98   : > { %1223 = vmatpush1.bf16.msra.mxu0 %v3684_v36  ;;  %1336 = vmatpush1.bf16.msra.mxu1 %v3687_v37  ;;  %v3780_v36 = vld [vmem:[#allocation5 + $0x8c] ss:$48 sps:$4 sm:$0xff]   ;;  %v3775_v37 = vld [vmem:[#allocation5 + $0x80] ss:$48 sps:$4 sm:$0xff]   ;;  %s3155_s13 = sshll.u32 %s353_s19, 4  ;;  %s3142_s1 = scalar_lea.sflag [#allocation4], %s4230_s22  ;;  %s4706_s13 = int_to_ptr.vmem [resolvable:$true] %s3155_s13 }
  0x99   : > { %1038 = vmatprep.mubr.bf16.mxu0 %v4034_v0  ;;  %1151 = vmatprep.mubr.bf16.mxu1 %v4034_v0  ;;  %s3951_s16 = scalar_lea.vmem %s4706_s13, 128  ;;  %p4778_p8 = scmp.ne.s32.totalorder %s4768_s11, 0 }
  0x9a   : > { %1224 = vmatprep.subr.bf16.mxu0 %v3693_v38  ;;  %1337 = vmatprep.subr.bf16.mxu1 %v3696_v39  ;;  %v3778_v38 = vld [vmem:[#allocation5 + $0x88] ss:$48 sps:$4 sm:$0xff]   ;;  %v3783_v39 = vld [vmem:[#allocation5 + $0x24] ss:$48 sps:$4 sm:$0xff]   ;;  %p3952_p4 = scmp.ne.s32.totalorder %s4706_s13, %s3951_s16  ;;  %s4037_s28 = smov [#allocation11]  }
  0x9b   : > { %s3955_s17 = sshll.u32 %s4037_s28, 4  ;;  %s3956_s17 = int_to_ptr.vmem [resolvable:$false] %s3955_s17 }
  0x9c   : > { %1225 = vmatpush1.bf16.msra.mxu0 %v3691_v40  ;;  %1338 = vmatpush1.bf16.msra.mxu1 %v3694_v41  ;;  %v3786_v40 = vld [vmem:[#allocation5 + $0x2c] ss:$48 sps:$4 sm:$0xff]   ;;  %v3781_v41 = vld [vmem:[#allocation5 + $0x20] ss:$48 sps:$4 sm:$0xff]   ;;  %p3953_p12 = pnand %p3952_p4, %p4778_p8  ;;  %s3957_s30 = scalar_lea.vmem %s3956_s17, 256 }
  0x9d   : > { %1226 = vmatprep.subr.bf16.mxu0 %v3700_v42  ;;  %1339 = vmatprep.subr.bf16.mxu1 %v3703_v43  ;;  %v3784_v42 = vld [vmem:[#allocation5 + $0x28] ss:$48 sps:$4 sm:$0xff]   ;;  %v3787_v43 = vld [vmem:[#allocation8 + $0x38] sm:$0xff]   ;;  %p3958_p3 = scmp.lt.s32.totalorder %s4706_s13, %s3956_s17  ;;  %p3959_p9 = scmp.lt.s32.totalorder %s3957_s30, %s3951_s16 }
  0x9e   : > { %p3954_p6 = pneg %p3953_p12 }
  0x9f   : > { %1039 = vmatmul.mubr.bf16.gmra.mxu0 %v4258_v44  ;;  %1152 = vmatmul.mubr.bf16.gmra.mxu1 %v4258_v44  ;;  %p3960_p13 = por %p3959_p9, %p3958_p3 }
  0xa0   : > { %1048 = vmatprep.mubr.bf16.mxu0 %v4034_v0  ;;  %1161 = vmatprep.mubr.bf16.mxu1 %v4034_v0 }
  0xa1   : > { %1227 = vmatpush1.bf16.msra.mxu0 %v3698_v45  ;;  %1340 = vmatpush1.bf16.msra.mxu1 %v3701_v46  ;;  %v4035_v45 = vmov 0.0   ;;  %v3788_v46 = vld [vmem:[#allocation8 + $0x30] sm:$0xff]   ;;  %p3961_p5 = pnand %p3960_p13, %p3954_p6 }
  0xa2   : > { %1228 = vmatprep.subr.bf16.mxu0 %v3707_v47  ;;  %1341 = vmatprep.subr.bf16.mxu1 %v3710_v48  ;;  %v3790_v47 = vld [vmem:[#allocation8 + $0x20] sm:$0xff]   ;;  %v3791_v48 = vld [vmem:[#allocation8 + $0x18] sm:$0xff]  }
  0xa5   : > { %1229 = vmatpush1.bf16.msra.mxu0 %v3705_v49  ;;  %1342 = vmatpush1.bf16.msra.mxu1 %v3708_v50  ;;  %v3793_v49 = vld [vmem:[#allocation8 + $0x8] sm:$0xff]   ;;  %v3794_v50 = vld [vmem:[#allocation8] sm:$0xff]  }
  0xa6   : > { %1230 = vmatprep.subr.bf16.mxu0 %v3714_v51  ;;  %1343 = vmatprep.subr.bf16.mxu1 %v3717_v52 }
  0xa7   : > { %1049 = vmatmul.mubr.bf16.gmra.mxu0 %v4265_v53  ;;  %1162 = vmatmul.mubr.bf16.gmra.mxu1 %v4265_v53 }
  0xa8   : > { %1058 = vmatprep.mubr.bf16.mxu0 %v4034_v0  ;;  %1171 = vmatprep.mubr.bf16.mxu1 %v4034_v0 }
  0xa9   : > { %1231 = vmatpush1.bf16.msra.mxu0 %v3712_v54  ;;  %1344 = vmatpush1.bf16.msra.mxu1 %v3715_v55 }
  0xaa   : > { %1232 = vmatprep.subr.bf16.mxu0 %v3721_v56  ;;  %1345 = vmatprep.subr.bf16.mxu1 %v3724_v57  ;;  %v3795_v57 = vld [vmem:[#allocation8 + $0x78] sm:$0xff]  }
  0xad   : > { %1233 = vmatpush1.bf16.msra.mxu0 %v3719_v58  ;;  %1346 = vmatpush1.bf16.msra.mxu1 %v3722_v59 }
  0xae   : > { %1234 = vmatprep.subr.bf16.mxu0 %v3728_v60  ;;  %1347 = vmatprep.subr.bf16.mxu1 %v3731_v61  ;;  %v3796_v61 = vld [vmem:[#allocation8 + $0x70] sm:$0xff]  }
  0xaf   : > { %1059 = vmatmul.mubr.bf16.gmra.mxu0 %v4272_v62  ;;  %1172 = vmatmul.mubr.bf16.gmra.mxu1 %v4272_v62 }
  0xb0   : > { %1068 = vmatprep.mubr.bf16.mxu0 %v4034_v0  ;;  %1181 = vmatprep.mubr.bf16.mxu1 %v4034_v0 }
  0xb1   : > { %1235 = vmatpush1.bf16.msra.mxu0 %v3726_v63  ;;  %1348 = vmatpush1.bf16.msra.mxu1 %v3729_v1 }
  0xb2   : > { %1236 = vmatprep.subr.bf16.mxu0 %v3735_v2  ;;  %1349 = vmatprep.subr.bf16.mxu1 %v3738_v3 }
  0xb5   : > { %1237 = vmatpush1.bf16.msra.mxu0 %v3733_v4  ;;  %1350 = vmatpush1.bf16.msra.mxu1 %v3736_v5  ;;  %v3797_v5 = vld [vmem:[#allocation8 + $0x68] sm:$0xff]  }
  0xb6   : > { %1448 = vmatprep.subr.bf16.mxu0 %v3741_v6  ;;  %1561 = vmatprep.subr.bf16.mxu1 %v3744_v7 }
  0xb7   : > { %1069 = vmatmul.mubr.bf16.gmra.mxu0 %v4279_v8  ;;  %1182 = vmatmul.mubr.bf16.gmra.mxu1 %v4279_v8 }
  0xb8   : > { %1078 = vmatprep.mubr.bf16.mxu0 %v4034_v0  ;;  %1191 = vmatprep.mubr.bf16.mxu1 %v4034_v0 }
  0xbf   : > { %1079 = vmatmul.mubr.bf16.gmra.mxu0 %v4286_v9  ;;  %1192 = vmatmul.mubr.bf16.gmra.mxu1 %v4286_v9 }
  0xc0   : > { %1088 = vmatprep.mubr.bf16.mxu0 %v4034_v0  ;;  %1201 = vmatprep.mubr.bf16.mxu1 %v4034_v0 }
  0xc7   : > { %1089 = vmatmul.mubr.bf16.gmra.mxu0 %v4293_v10  ;;  %1202 = vmatmul.mubr.bf16.gmra.mxu1 %v4293_v10 }
  0xc8   : > { %1098 = vmatprep.mubr.bf16.mxu0 %v4034_v0  ;;  %1211 = vmatprep.mubr.bf16.mxu1 %v4034_v0 }
  0xcf   : > { %1099 = vmatmul.mubr.bf16.gmra.mxu0 %v4300_v11  ;;  %1212 = vmatmul.mubr.bf16.gmra.mxu1 %v4300_v11 }
  0xd0   : > { %1254 = vmatprep.mubr.bf16.mxu0 %v4034_v0  ;;  %1367 = vmatprep.mubr.bf16.mxu1 %v4034_v0 }
  0xd7   : > { %1255 = vmatmul.mubr.bf16.vlgmr.msra.gmra.mxu0 %v4251_v35  ;;  %1368 = vmatmul.mubr.bf16.vlgmr.msra.gmra.mxu1 %v4251_v35 }
  0xd8   : > { %1449 = vmatpush1.bf16.msra.mxu0 %v3739_v12  ;;  %1562 = vmatpush1.bf16.msra.mxu1 %v3742_v13 }
  0xd9   : > { %1264 = vmatprep.mubr.bf16.mxu0 %v4034_v0  ;;  %1377 = vmatprep.mubr.bf16.mxu1 %v4034_v0 }
  0xda   : > { %1450 = vmatprep.subr.bf16.mxu0 %v3747_v14  ;;  %1563 = vmatprep.subr.bf16.mxu1 %v3750_v15 }
  0xdc   : > { %1451 = vmatpush1.bf16.msra.mxu0 %v3745_v16  ;;  %1564 = vmatpush1.bf16.msra.mxu1 %v3748_v17 }
  0xdd   : > { %1452 = vmatprep.subr.bf16.mxu0 %v3753_v18  ;;  %1565 = vmatprep.subr.bf16.mxu1 %v3756_v19  ;;  %v3798_v19 = vld [vmem:[#allocation8 + $0x60] sm:$0xff]  }
  0xdf   : > { %1265 = vmatmul.mubr.bf16.gmra.mxu0 %v4258_v44  ;;  %1378 = vmatmul.mubr.bf16.gmra.mxu1 %v4258_v44 }
  0xe0   : > { %1274 = vmatprep.mubr.bf16.mxu0 %v4034_v0  ;;  %1387 = vmatprep.mubr.bf16.mxu1 %v4034_v0 }
  0xe1   : > { %1453 = vmatpush1.bf16.msra.mxu0 %v3751_v20  ;;  %1566 = vmatpush1.bf16.msra.mxu1 %v3754_v21 }
  0xe2   : > { %1454 = vmatprep.subr.bf16.mxu0 %v3759_v22  ;;  %1567 = vmatprep.subr.bf16.mxu1 %v3762_v23 }
  0xe5   : > { %1455 = vmatpush1.bf16.msra.mxu0 %v3757_v24  ;;  %1568 = vmatpush1.bf16.msra.mxu1 %v3760_v25 }
  0xe6   : > { %1456 = vmatprep.subr.bf16.mxu0 %v3765_v26  ;;  %1569 = vmatprep.subr.bf16.mxu1 %v3768_v27 }
  0xe7   : > { %1275 = vmatmul.mubr.bf16.gmra.mxu0 %v4265_v53  ;;  %1388 = vmatmul.mubr.bf16.gmra.mxu1 %v4265_v53 }
  0xe8   : > { %1284 = vmatprep.mubr.bf16.mxu0 %v4034_v0  ;;  %1397 = vmatprep.mubr.bf16.mxu1 %v4034_v0 }
  0xe9   : > { %1457 = vmatpush1.bf16.msra.mxu0 %v3763_v28  ;;  %1570 = vmatpush1.bf16.msra.mxu1 %v3766_v29 }
  0xea   : > { %1458 = vmatprep.subr.bf16.mxu0 %v3771_v30  ;;  %1571 = vmatprep.subr.bf16.mxu1 %v3774_v31 }
  0xed   : > { %1459 = vmatpush1.bf16.msra.mxu0 %v3769_v32  ;;  %1572 = vmatpush1.bf16.msra.mxu1 %v3772_v33  ;;  %v3799_v33 = vld [vmem:[#allocation8 + $0x58] sm:$0xff]  }
  0xee   : > { %1460 = vmatprep.subr.bf16.mxu0 %v3777_v34  ;;  %1573 = vmatprep.subr.bf16.mxu1 %v3780_v36 }
  0xef   : > { %1285 = vmatmul.mubr.bf16.gmra.mxu0 %v4272_v62  ;;  %1398 = vmatmul.mubr.bf16.gmra.mxu1 %v4272_v62 }
  0xf0   : > { %1294 = vmatprep.mubr.bf16.mxu0 %v4034_v0  ;;  %1407 = vmatprep.mubr.bf16.mxu1 %v4034_v0 }
  0xf1   : > { %1461 = vmatpush1.bf16.msra.mxu0 %v3775_v37  ;;  %1574 = vmatpush1.bf16.msra.mxu1 %v3778_v38 }
  0xf2   : > { %1462 = vmatprep.subr.bf16.mxu0 %v3783_v39  ;;  %1575 = vmatprep.subr.bf16.mxu1 %v3786_v40 }
  0xf5   : > { %1463 = vmatpush1.bf16.msra.mxu0 %v3781_v41  ;;  %1576 = vmatpush1.bf16.msra.mxu1 %v3784_v42 }
  0xf6   : > { %3481 = vmatprep.subr.bf16.mxu1 %v4035_v45  ;;  %3461 = vmatprep.subr.bf16.mxu0 %v4035_v45 }
  0xf7   : > { %1295 = vmatmul.mubr.bf16.gmra.mxu0 %v4279_v8  ;;  %1408 = vmatmul.mubr.bf16.gmra.mxu1 %v4279_v8 }
  0xf8   : > { %1304 = vmatprep.mubr.bf16.mxu0 %v4034_v0  ;;  %1417 = vmatprep.mubr.bf16.mxu1 %v4034_v0 }
  0xff   : > { %1305 = vmatmul.mubr.bf16.gmra.mxu0 %v4286_v9  ;;  %1418 = vmatmul.mubr.bf16.gmra.mxu1 %v4286_v9 }
 0x100   : > { %1314 = vmatprep.mubr.bf16.mxu0 %v4034_v0  ;;  %1427 = vmatprep.mubr.bf16.mxu1 %v4034_v0 }
 0x107   : > { %1315 = vmatmul.mubr.bf16.gmra.mxu0 %v4293_v10  ;;  %1428 = vmatmul.mubr.bf16.gmra.mxu1 %v4293_v10 }
 0x108   : > { %1324 = vmatprep.mubr.bf16.mxu0 %v4034_v0  ;;  %1437 = vmatprep.mubr.bf16.mxu1 %v4034_v0 }
 0x10f   : > { %1325 = vmatmul.mubr.bf16.gmra.mxu0 %v4300_v11  ;;  %1438 = vmatmul.mubr.bf16.gmra.mxu1 %v4300_v11 }
 0x110   : > { %1480 = vmatprep.mubr.bf16.mxu0 %v4034_v0  ;;  %1593 = vmatprep.mubr.bf16.mxu1 %v4034_v0 }
 0x117   : > { %1481 = vmatmul.mubr.bf16.vlgmr.msra.gmra.mxu0 %v4251_v35  ;;  %1594 = vmatmul.mubr.bf16.vlgmr.msra.gmra.mxu1 %v4251_v35  ;;  %v3789_v35 = vld [vmem:[#allocation8 + $0x28] sm:$0xff]  }
 0x118   : > { %1490 = vmatprep.mubr.bf16.mxu0 %v4034_v0  ;;  %1603 = vmatprep.mubr.bf16.mxu1 %v4034_v0 }
 0x119   : > { %3482 = vmatpush3.bf16.msra.mxu1 %v3787_v43  ;;  %3462 = vmatpush3.bf16.msra.mxu0 %v3795_v57 }
 0x11a   : > { %3483 = vmatprep.subr.bf16.mxu1 %v4035_v45  ;;  %3463 = vmatprep.subr.bf16.mxu0 %v4035_v45 }
 0x11d   : > { %3484 = vmatpush3.bf16.msra.mxu1 %v3788_v46  ;;  %3464 = vmatpush3.bf16.msra.mxu0 %v3796_v61  ;;  %v3801_v61 = vld [vmem:[#allocation8 + $0x48] sm:$0xff]  }
 0x11e   : > { %3485 = vmatprep.subr.bf16.mxu1 %v4035_v45  ;;  %3465 = vmatprep.subr.bf16.mxu0 %v4035_v45 }
 0x11f   : > { %1491 = vmatmul.mubr.bf16.gmra.mxu0 %v4258_v44  ;;  %1604 = vmatmul.mubr.bf16.gmra.mxu1 %v4258_v44  ;;  %v3792_v44 = vld [vmem:[#allocation8 + $0x10] sm:$0xff]  }
 0x120   : > { %1500 = vmatprep.mubr.bf16.mxu0 %v4034_v0  ;;  %1613 = vmatprep.mubr.bf16.mxu1 %v4034_v0 }
 0x121   : > { %3486 = vmatpush3.bf16.msra.mxu1 %v3789_v35  ;;  %3466 = vmatpush3.bf16.msra.mxu0 %v3797_v5 }
 0x122   : > { %3487 = vmatprep.subr.bf16.mxu1 %v4035_v45  ;;  %3467 = vmatprep.subr.bf16.mxu0 %v4035_v45 }
 0x125   : > { %3488 = vmatpush3.bf16.msra.mxu1 %v3790_v47  ;;  %3468 = vmatpush3.bf16.msra.mxu0 %v3798_v19 }
 0x126   : > { %3489 = vmatprep.subr.bf16.mxu1 %v4035_v45  ;;  %3469 = vmatprep.subr.bf16.mxu0 %v4035_v45 }
 0x127   : > { %1501 = vmatmul.mubr.bf16.gmra.mxu0 %v4265_v53  ;;  %1614 = vmatmul.mubr.bf16.gmra.mxu1 %v4265_v53 }
 0x128   : > { %1510 = vmatprep.mubr.bf16.mxu0 %v4034_v0  ;;  %1623 = vmatprep.mubr.bf16.mxu1 %v4034_v0 }
 0x129   : > { %3490 = vmatpush3.bf16.msra.mxu1 %v3791_v48  ;;  %3470 = vmatpush3.bf16.msra.mxu0 %v3799_v33  ;;  %v3800_v48 = vld [vmem:[#allocation8 + $0x50] sm:$0xff]  }
 0x12a   : > { %3491 = vmatprep.subr.bf16.mxu1 %v4035_v45  ;;  %3471 = vmatprep.subr.bf16.mxu0 %v4035_v45 }
 0x12d   : > { %3492 = vmatpush3.bf16.msra.mxu1 %v3792_v44  ;;  %3472 = vmatpush3.bf16.msra.mxu0 %v3800_v48 }
 0x12e   : > { %3493 = vmatprep.subr.bf16.mxu1 %v4035_v45  ;;  %3473 = vmatprep.subr.bf16.mxu0 %v4035_v45 }
 0x12f   : > { %1511 = vmatmul.mubr.bf16.gmra.mxu0 %v4272_v62  ;;  %1624 = vmatmul.mubr.bf16.gmra.mxu1 %v4272_v62 }
 0x130   : > { %1520 = vmatprep.mubr.bf16.mxu0 %v4034_v0  ;;  %1633 = vmatprep.mubr.bf16.mxu1 %v4034_v0 }
 0x131   : > { %3494 = vmatpush3.bf16.msra.mxu1 %v3793_v49  ;;  %3474 = vmatpush3.bf16.msra.mxu0 %v3801_v61 }
 0x132   : > { %3495 = vmatprep.subr.bf16.mxu1 %v4035_v45  ;;  %3475 = vmatprep.subr.bf16.mxu0 %v4035_v45 }
 0x135   : > { %3496 = vmatpush3.bf16.msra.mxu1 %v3794_v50 }
 0x136   : > { %3521 = vmatprep.subr.bf16.mxu1 %v4035_v45 }
 0x137   : > { %1521 = vmatmul.mubr.bf16.gmra.mxu0 %v4279_v8  ;;  %1634 = vmatmul.mubr.bf16.gmra.mxu1 %v4279_v8 }
 0x138   : > { %1530 = vmatprep.mubr.bf16.mxu0 %v4034_v0  ;;  %1643 = vmatprep.mubr.bf16.mxu1 %v4034_v0 }
 0x13f   : > { %1531 = vmatmul.mubr.bf16.gmra.mxu0 %v4286_v9  ;;  %1644 = vmatmul.mubr.bf16.gmra.mxu1 %v4286_v9 }
 0x140   : > { %1540 = vmatprep.mubr.bf16.mxu0 %v4034_v0  ;;  %1653 = vmatprep.mubr.bf16.mxu1 %v4034_v0 }
 0x147   : > { %1541 = vmatmul.mubr.bf16.gmra.mxu0 %v4293_v10  ;;  %1654 = vmatmul.mubr.bf16.gmra.mxu1 %v4293_v10 }
 0x148   : > { %1550 = vmatprep.mubr.bf16.mxu0 %v4034_v0  ;;  %1663 = vmatprep.mubr.bf16.mxu1 %v4034_v0 }
 0x14f   : > { %1551 = vmatmul.mubr.bf16.gmra.mxu0 %v4300_v11  ;;  %1664 = vmatmul.mubr.bf16.gmra.mxu1 %v4300_v11 }
 0x150   : > { %3497 = vmatprep.mubr.msk.bf16.mxu1 %vm4036_vm0, %v4035_v45  ;;  %3477 = vmatprep.mubr.msk.bf16.mxu0 %vm4036_vm0, %v4035_v45 }
 0x157   : > { %v1030_v51 = vpop.f32.mrf.mxu0  ;;  %v1143_v52 = vpop.f32.mrf.mxu1 }
 0x158   : > { %v1765_v8 = vrot.slane %v1143_v52, 2 }
 0x159   : > { %v1032_v53 = vpop.f32.mrf.mxu0  ;;  %v4382_v54 = vpop.f32.mrf.mxu1 }
 0x15a   : > { %v1692_v2 = vrot.slane %v1032_v53, 1 }
 0x15b   : > { %v1034_v55 = vpop.f32.mrf.mxu0  ;;  %v1147_v56 = vpop.f32.mrf.mxu1 }
 0x15c   : > { %v1766_v9 = vrot.slane %v1147_v56, 2 }
 0x15d   : > { %v1036_v0 = vpop.f32.mrf.mxu0  ;;  %v4384_v58 = vpop.f32.mrf.mxu1 }
 0x15e   : > { %v1693_v62 = vrot.slane %v1036_v0, 1  ;;  %v1767_v26 = vsel %vm1764_vm2, %v1765_v8, %v1766_v9 }
 0x15f   : > { %v1040_v59 = vpop.f32.mrf.mxu0  ;;  %v1153_v60 = vpop.f32.mrf.mxu1 }
 0x160   : > { %v1694_v6 = vsel %vm1691_vm1, %v1692_v2, %v1693_v62  ;;  %v1733_v7 = vadd.f32 %v1693_v62, %v1034_v55  ;;  %v1768_v12 = vrot.slane %v1153_v60, 2 }
 0x161   : > { %v1042_v63 = vpop.f32.mrf.mxu0  ;;  %v4387_v1 = vpop.f32.mrf.mxu1  ;;  %v1732_v16 = vadd.f32 %v1694_v6, %v1030_v51 }
 0x162   : > { %v1695_v13 = vrot.slane %v1042_v63, 1  ;;  %v1806_v20 = vadd.f32 %v1766_v9, %v1733_v7 }
 0x163   : > { %v1044_v3 = vpop.f32.mrf.mxu0  ;;  %v1157_v4 = vpop.f32.mrf.mxu1  ;;  %v1805_v29 = vadd.f32 %v1767_v26, %v1732_v16 }
 0x164   : > { %v1769_v14 = vrot.slane %v1157_v4, 2  ;;  %v1821_v34 = vsel %vm1764_vm2, %v1806_v20, -inf }
 0x165   : > { %v1046_v10 = vpop.f32.mrf.mxu0  ;;  %v4391_v11 = vpop.f32.mrf.mxu1  ;;  %v1822_v46 = vmax.f32 %v1805_v29, %v1821_v34 }
 0x166   : > { %v1696_v15 = vrot.slane %v1046_v10, 1  ;;  %v1770_v27 = vsel %vm1764_vm2, %v1768_v12, %v1769_v14 }
 0x167   : > { %v1050_v17 = vpop.f32.mrf.mxu0  ;;  %v1163_v18 = vpop.f32.mrf.mxu1  ;;  %v1823_v57 = vrot.slane %v1822_v46, 4 }
 0x168   : > { %v1697_v21 = vsel %vm1691_vm1, %v1695_v13, %v1696_v15  ;;  %v1735_v22 = vadd.f32 %v1696_v15, %v1044_v3  ;;  %v1771_v40 = vrot.slane %v1163_v18, 2  ;;  %v1885_v18 = vlaneseq }
 0x169   : > { %v1734_v23 = vadd.f32 %v1697_v21, %v1040_v59  ;;  %v1052_v24 = vpop.f32.mrf.mxu0  ;;  %v4395_v25 = vpop.f32.mrf.mxu1  ;;  %v1824_v9 = vmax.f32 %v1822_v46, %v1823_v57 }
 0x16a   : > { %v1808_v28 = vadd.f32 %v1769_v14, %v1735_v22  ;;  %v1698_v41 = vrot.slane %v1052_v24, 1  ;;  %v3802_v14 = vld [vmem:[#allocation8 + $0x40] sm:$0xff]   ;;  %v4420_v33 = vshrl.u32 %v1885_v18, 7 }
 0x16b   : > { %v1807_v30 = vadd.f32 %v1770_v27, %v1734_v23  ;;  %v1054_v31 = vpop.f32.mrf.mxu0  ;;  %v1167_v32 = vpop.f32.mrf.mxu1  ;;  %3476 = vmatpush3.bf16.msra.mxu0 %v3802_v14  ;;  %v1825_v26 = vrot.slane %v1824_v9, 2 }
 0x16c   : > { %v1829_v36 = vsel %vm1764_vm2, %v1808_v28, -inf  ;;  %v1772_v42 = vrot.slane %v1167_v32, 2  ;;  %3501 = vmatprep.subr.bf16.mxu0 %v4035_v45 }
 0x16d   : > { %v1830_v37 = vmax.f32 %v1807_v30, %v1829_v36  ;;  %v1056_v38 = vpop.f32.mrf.mxu0  ;;  %v4402_v39 = vpop.f32.mrf.mxu1  ;;  %v1826_v46 = vmax.f32 %v1824_v9, %v1825_v26 }
 0x16e   : > { %v1699_v43 = vrot.slane %v1056_v38, 1  ;;  %v1773_v55 = vsel %vm1764_vm2, %v1771_v40, %v1772_v42 }
 0x16f   : > { %v1060_v35 = vpop.f32.mrf.mxu0  ;;  %v1173_v47 = vpop.f32.mrf.mxu1  ;;  %v1831_v44 = vrot.slane %v1830_v37, 4 }
 0x170   : > { %v1700_v49 = vsel %vm1691_vm1, %v1698_v41, %v1699_v43  ;;  %v1737_v50 = vadd.f32 %v1699_v43, %v1054_v31  ;;  %v1774_v5 = vrot.slane %v1173_v47, 2 }
 0x171   : > { %v1736_v51 = vadd.f32 %v1700_v49, %v1050_v17  ;;  %v1062_v52 = vpop.f32.mrf.mxu0  ;;  %v4406_v53 = vpop.f32.mrf.mxu1  ;;  %v1832_v62 = vmax.f32 %v1830_v37, %v1831_v44 }
 0x172   : > { %v1810_v56 = vadd.f32 %v1772_v42, %v1737_v50  ;;  %v1701_v6 = vrot.slane %v1062_v52, 1  ;;  %v1887_v52 = vsub.s32 0, %v4420_v33 }
 0x173   : > { %v1809_v0 = vadd.f32 %v1773_v55, %v1736_v51  ;;  %v1064_v59 = vpop.f32.mrf.mxu0  ;;  %v1177_v60 = vpop.f32.mrf.mxu1  ;;  %v1833_v15 = vrot.slane %v1832_v62, 2 }
 0x174   : > { %v1837_v63 = vsel %vm1764_vm2, %v1810_v56, -inf  ;;  %v1775_v7 = vrot.slane %v1177_v60, 2 }
 0x175   : > { %v1838_v2 = vmax.f32 %v1809_v0, %v1837_v63  ;;  %v1066_v3 = vpop.f32.mrf.mxu0  ;;  %v4411_v4 = vpop.f32.mrf.mxu1  ;;  %v1834_v31 = vmax.f32 %v1832_v62, %v1833_v15  ;;  %v1827_v62 = vrot.slane %v1826_v46, 1 }
 0x176   : > { %v1702_v8 = vrot.slane %v1066_v3, 1  ;;  %v1776_v23 = vsel %vm1764_vm2, %v1774_v5, %v1775_v7 }
 0x177   : > { %v1839_v10 = vrot.slane %v1838_v2, 4  ;;  %v1070_v12 = vpop.f32.mrf.mxu0  ;;  %v1183_v13 = vpop.f32.mrf.mxu1  ;;  %v1835_v44 = vrot.slane %v1834_v31, 1 }
 0x178   : > { %v1703_v16 = vsel %vm1691_vm1, %v1701_v6, %v1702_v8  ;;  %v1739_v17 = vadd.f32 %v1702_v8, %v1064_v59  ;;  %v1777_v40 = vrot.slane %v1183_v13, 2  ;;  %v4428_v59 = vld [vmem:[#allocation7] sm:$0x7] }
 0x179   : > { %v1840_v19 = vmax.f32 %v1838_v2, %v1839_v10  ;;  %v1738_v20 = vadd.f32 %v1703_v16, %v1060_v35  ;;  %v1072_v21 = vpop.f32.mrf.mxu0  ;;  %v4415_v22 = vpop.f32.mrf.mxu1  ;;  %v1836_v6 = vmax.f32 %v1834_v31, %v1835_v44  ;;  %v4433_v9 = vrot.slane %v4428_v59, %v1887_v52 }
 0x17a   : > { %v1812_v24 = vadd.f32 %v1775_v7, %v1739_v17  ;;  %v1704_v41 = vrot.slane %v1072_v21, 1 }
 0x17b   : > { %v1841_v27 = vrot.slane %v1840_v19, 2  ;;  %v1811_v28 = vadd.f32 %v1776_v23, %v1738_v20  ;;  %v1074_v29 = vpop.f32.mrf.mxu0  ;;  %v1187_v30 = vpop.f32.mrf.mxu1  ;;  %v1890_v26 = vadd.f32 %v4433_v9, %v1836_v6 }
 0x17c   : > { %v1845_v32 = vsel %vm1764_vm2, %v1812_v24, -inf  ;;  %v1778_v42 = vrot.slane %v1187_v30, 2 }
 0x17d   : > { %v1842_v34 = vmax.f32 %v1840_v19, %v1841_v27  ;;  %v1846_v36 = vmax.f32 %v1811_v28, %v1845_v32  ;;  %v1076_v37 = vpop.f32.mrf.mxu0  ;;  %v4422_v38 = vpop.f32.mrf.mxu1  ;;  %v1828_v19 = vmax.f32 %v1826_v46, %v1827_v62 }
 0x17e   : > { %v1705_v43 = vrot.slane %v1076_v37, 1  ;;  %v1779_v60 = vsel %vm1764_vm2, %v1777_v40, %v1778_v42 }
 0x17f   : > { %v1847_v35 = vrot.slane %v1846_v36, 4  ;;  %v1080_v47 = vpop.f32.mrf.mxu0  ;;  %v1193_v48 = vpop.f32.mrf.mxu1  ;;  %v1843_v49 = vrot.slane %v1842_v34, 1 }
 0x180   : > { %v1706_v50 = vsel %vm1691_vm1, %v1704_v41, %v1705_v43  ;;  %v1741_v51 = vadd.f32 %v1705_v43, %v1074_v29  ;;  %v1780_v15 = vrot.slane %v1193_v48, 2  ;;  %v1889_v41 = vadd.f32 %v4433_v9, %v1828_v19 }
 0x181   : > { %v1848_v55 = vmax.f32 %v1846_v36, %v1847_v35  ;;  %v1740_v56 = vadd.f32 %v1706_v50, %v1070_v12  ;;  %v1082_v57 = vpop.f32.mrf.mxu0  ;;  %v4426_v0 = vpop.f32.mrf.mxu1  ;;  %v1844_v7 = vmax.f32 %v1842_v34, %v1843_v49  ;;  %v1898_v48 = vmax.f32 %v1890_v26, 0.0 }
 0x182   : > { %v1814_v61 = vadd.f32 %v1778_v42, %v1741_v51  ;;  %v1707_v16 = vrot.slane %v1082_v57, 1  ;;  %v1897_v62 = vmax.f32 %v1889_v41, 0.0 }
 0x183   : > { %v1849_v63 = vrot.slane %v1848_v55, 2  ;;  %v1813_v2 = vadd.f32 %v1779_v60, %v1740_v56  ;;  %v1084_v3 = vpop.f32.mrf.mxu0  ;;  %v1197_v5 = vpop.f32.mrf.mxu1  ;;  %v1891_v27 = vadd.f32 %v4433_v9, %v1844_v7  ;;  %v1906_v6 = vpack.c.bf16 %v1898_v48, %v1898_v48 }
 0x184   : > { %v1853_v8 = vsel %vm1764_vm2, %v1814_v61, -inf  ;;  %v1781_v17 = vrot.slane %v1197_v5, 2 }
 0x185   : > { %v1850_v10 = vmax.f32 %v1848_v55, %v1849_v63  ;;  %v1854_v12 = vmax.f32 %v1813_v2, %v1853_v8  ;;  %v1086_v13 = vpop.f32.mrf.mxu0  ;;  %v4435_v14 = vpop.f32.mrf.mxu1  ;;  %v1899_v44 = vmax.f32 %v1891_v27, 0.0 }
 0x186   : > { %v1708_v18 = vrot.slane %v1086_v13, 1  ;;  %v1782_v37 = vsel %vm1764_vm2, %v1780_v15, %v1781_v17 }
 0x187   : > { %v1851_v20 = vrot.slane %v1850_v10, 1  ;;  %v1855_v21 = vrot.slane %v1854_v12, 4  ;;  %v1090_v23 = vpop.f32.mrf.mxu0  ;;  %v1203_v24 = vpop.f32.mrf.mxu1  ;;  %v1907_v7 = vpack.c.bf16 %v1899_v44, %v1899_v44 }
 0x188   : > { %v1709_v28 = vsel %vm1691_vm1, %v1707_v16, %v1708_v18  ;;  %v1743_v29 = vadd.f32 %v1708_v18, %v1084_v3  ;;  %v1783_v56 = vrot.slane %v1203_v24, 2 }
 0x189   : > { %v1852_v30 = vmax.f32 %v1850_v10, %v1851_v20  ;;  %v1856_v31 = vmax.f32 %v1854_v12, %v1855_v21  ;;  %v1742_v32 = vadd.f32 %v1709_v28, %v1080_v47  ;;  %v1092_v34 = vpop.f32.mrf.mxu0  ;;  %v4440_v36 = vpop.f32.mrf.mxu1 }
 0x18a   : > { %v1816_v40 = vadd.f32 %v1781_v17, %v1743_v29  ;;  %v1710_v57 = vrot.slane %v1092_v34, 1  ;;  %v4453_v29 = vpack.c.bf16 %v1897_v62, %v1897_v62 }
 0x18b   : > { %v1857_v42 = vrot.slane %v1856_v31, 2  ;;  %v1815_v43 = vadd.f32 %v1782_v37, %v1742_v32  ;;  %v1094_v46 = vpop.f32.mrf.mxu0  ;;  %v1207_v35 = vpop.f32.mrf.mxu1  ;;  %v1892_v50 = vadd.f32 %v4433_v9, %v1852_v30  ;;  %v2390_v30 = vunpack.c.l.b16 %v1906_v6 }
 0x18c   : > { %v1861_v49 = vsel %vm1764_vm2, %v1816_v40, -inf  ;;  %v1784_v60 = vrot.slane %v1207_v35, 2 }
 0x18d   : > { %v1858_v51 = vmax.f32 %v1856_v31, %v1857_v42  ;;  %v1862_v47 = vmax.f32 %v1815_v43, %v1861_v49  ;;  %v1096_v52 = vpop.f32.mrf.mxu0  ;;  %v4446_v55 = vpop.f32.mrf.mxu1  ;;  %v1900_v12 = vmax.f32 %v1892_v50, 0.0  ;;  %v2391_v31 = vunpack.c.l.b16 %v1907_v7 }
 0x18e   : > { %v1711_v61 = vrot.slane %v1096_v52, 1  ;;  %v1785_v19 = vsel %vm1764_vm2, %v1783_v56, %v1784_v60 }
 0x18f   : > { %v1859_v63 = vrot.slane %v1858_v51, 1  ;;  %v1863_v2 = vrot.slane %v1862_v47, 4  ;;  %v1100_v3 = vpop.f32.mrf.mxu0  ;;  %v1213_v5 = vpop.f32.mrf.mxu1  ;;  %v2399_v6 = vrot.slane %v2391_v31, 6 }
 0x190   : > { %v1712_v8 = vsel %vm1691_vm1, %v1710_v57, %v1711_v61  ;;  %v1745_v10 = vadd.f32 %v1711_v61, %v1094_v46  ;;  %v1786_v43 = vrot.slane %v1213_v5, 2 }
 0x191   : > { %v1860_v13 = vmax.f32 %v1858_v51, %v1859_v63  ;;  %v1864_v15 = vmax.f32 %v1862_v47, %v1863_v2  ;;  %v1744_v16 = vadd.f32 %v1712_v8, %v1090_v23  ;;  %v1102_v17 = vpop.f32.mrf.mxu0  ;;  %v4449_v18 = vpop.f32.mrf.mxu1  ;;  %v4456_v23 = vpack.c.bf16 %v1900_v12, %v1900_v12 }
 0x192   : > { %v1818_v20 = vadd.f32 %v1784_v60, %v1745_v10  ;;  %v1713_v46 = vrot.slane %v1102_v17, 1  ;;  %v2389_v47 = vunpack.c.l.b16 %v4453_v29  ;;  %v2397_v60 = vrot.slane %v2390_v30, 7 }
 0x193   : > { %v1893_v21 = vadd.f32 %v4433_v9, %v1860_v13  ;;  %v1865_v24 = vrot.slane %v1864_v15, 2  ;;  %v1817_v26 = vadd.f32 %v1785_v19, %v1744_v16  ;;  %v1104_v27 = vpop.f32.mrf.mxu0  ;;  %v1217_v28 = vpop.f32.mrf.mxu1  ;;  %v2392_v7 = vunpack.c.l.b16 %v4456_v23 }
 0x194   : > { %v1869_v32 = vsel %vm1764_vm2, %v1818_v20, -inf  ;;  %v1787_v35 = vrot.slane %v1217_v28, 2 }
 0x195   : > { %v1901_v34 = vmax.f32 %v1893_v21, 0.0  ;;  %v1866_v37 = vmax.f32 %v1864_v15, %v1865_v24  ;;  %v1870_v40 = vmax.f32 %v1817_v26, %v1869_v32  ;;  %v1106_v41 = vpop.f32.mrf.mxu0  ;;  %v4458_v42 = vpop.f32.mrf.mxu1 }
 0x196   : > { %v1714_v48 = vrot.slane %v1106_v41, 1  ;;  %v1788_v8 = vsel %vm1764_vm2, %v1786_v43, %v1787_v35 }
 0x197   : > { %v1867_v44 = vrot.slane %v1866_v37, 1  ;;  %v1871_v49 = vrot.slane %v1870_v40, 4  ;;  %v1256_v50 = vpop.f32.mrf.mxu0  ;;  %v1369_v51 = vpop.f32.mrf.mxu1  ;;  %v1909_v52 = vpack.c.bf16 %v1901_v34, %v1901_v34 }
 0x198   : > { %v1715_v56 = vsel %vm1691_vm1, %v1713_v46, %v1714_v48  ;;  %v1747_v57 = vadd.f32 %v1714_v48, %v1104_v27  ;;  %v1945_v16 = vrot.slane %v1256_v50, 1  ;;  %v2212_v46 = vsub.s32 1, %v4420_v33 }
 0x199   : > { %v1868_v61 = vmax.f32 %v1866_v37, %v1867_v44  ;;  %v1872_v62 = vmax.f32 %v1870_v40, %v1871_v49  ;;  %v1746_v63 = vadd.f32 %v1715_v56, %v1100_v3  ;;  %v1258_v2 = vpop.f32.mrf.mxu0  ;;  %v4462_v5 = vpop.f32.mrf.mxu1  ;;  %v2393_v20 = vunpack.c.l.b16 %v1909_v52 }
 0x19a   : > { %v1820_v10 = vadd.f32 %v1787_v35, %v1747_v57  ;;  %v2090_v3 = vrot.slane %v1369_v51, 3  ;;  %v2017_v29 = vrot.slane %v1258_v2, 2  ;;  %v2398_v44 = vsel %vm2271_vm3, %v2397_v60, %v2389_v47 }
 0x19b   : > { %v1894_v12 = vadd.f32 %v4433_v9, %v1868_v61  ;;  %v1873_v13 = vrot.slane %v1872_v62, 2  ;;  %v1819_v15 = vadd.f32 %v1788_v8, %v1746_v63  ;;  %v1260_v17 = vpop.f32.mrf.mxu0  ;;  %v1373_v19 = vpop.f32.mrf.mxu1  ;;  %v2400_v52 = vsel %vm2274_vm4, %v2399_v6, %v2398_v44 }
 0x19c   : > { %v1877_v21 = vsel %vm1764_vm2, %v1820_v10, -inf  ;;  %v1946_v24 = vrot.slane %v1260_v17, 1  ;;  %v2091_v34 = vrot.slane %v1373_v19, 3  ;;  %v2403_v63 = vrot.slane %v2393_v20, 4 }
 0x19d   : > { %v1902_v26 = vmax.f32 %v1894_v12, 0.0  ;;  %v1874_v27 = vmax.f32 %v1872_v62, %v1873_v13  ;;  %v1878_v28 = vmax.f32 %v1819_v15, %v1877_v21  ;;  %v1262_v30 = vpop.f32.mrf.mxu0  ;;  %v4468_v31 = vpop.f32.mrf.mxu1 }
 0x19e   : > { %v1947_v32 = vsel %vm1691_vm1, %v1945_v16, %v1946_v24  ;;  %v1986_v23 = vadd.f32 %v1946_v24, %v4384_v58  ;;  %v2018_v37 = vrot.slane %v1262_v30, 2  ;;  %v2092_v2 = vsel %vm2089_vm5, %v2090_v3, %v2091_v34 }
 0x19f   : > { %v1875_v40 = vrot.slane %v1874_v27, 1  ;;  %v1879_v41 = vrot.slane %v1878_v28, 4  ;;  %v1985_v43 = vadd.f32 %v1947_v32, %v4382_v54  ;;  %v1266_v35 = vpop.f32.mrf.mxu0  ;;  %v1379_v48 = vpop.f32.mrf.mxu1  ;;  %v1910_v49 = vpack.c.bf16 %v1902_v26, %v1902_v26 }
 0x1a0   : > { %v2019_v50 = vsel %vm1764_vm2, %v2017_v29, %v2018_v37  ;;  %v2058_v51 = vadd.f32 %v2018_v37, %v1986_v23  ;;  %v2401_v54 = vrot.slane %v2392_v7, 5  ;;  %v1948_v12 = vrot.slane %v1266_v35, 1 }
 0x1a1   : > { %v1876_v58 = vmax.f32 %v1874_v27, %v1875_v40  ;;  %v1880_v56 = vmax.f32 %v1878_v28, %v1879_v41  ;;  %v2057_v57 = vadd.f32 %v2019_v50, %v1985_v43  ;;  %v1268_v61 = vpop.f32.mrf.mxu0  ;;  %v4477_v62 = vpop.f32.mrf.mxu1  ;;  %v2394_v16 = vunpack.c.l.b16 %v1910_v49 }
 0x1a2   : > { %v2131_v8 = vadd.f32 %v2091_v34, %v2058_v51  ;;  %v2093_v17 = vrot.slane %v1379_v48, 3  ;;  %v2020_v7 = vrot.slane %v1268_v61, 2  ;;  %v4488_v43 = vrot.slane %v4428_v59, %v2212_v46 }
 0x1a3   : > { %v1895_v10 = vadd.f32 %v4433_v9, %v1876_v58  ;;  %v1881_v47 = vrot.slane %v1880_v56, 2  ;;  %v2130_v60 = vadd.f32 %v2092_v2, %v2057_v57  ;;  %v1270_v13 = vpop.f32.mrf.mxu0  ;;  %v1383_v15 = vpop.f32.mrf.mxu1  ;;  %v2402_v44 = vsel %vm2277_vm6, %v2401_v54, %v2400_v52 }
 0x1a4   : > { %v2146_v6 = vsel %vm2089_vm5, %v2131_v8, -inf  ;;  %v1949_v19 = vrot.slane %v1270_v13, 1  ;;  %v2094_v29 = vrot.slane %v1383_v15, 3  ;;  %v2405_v57 = vrot.slane %v2394_v16, 3 }
 0x1a5   : > { %v1903_v21 = vmax.f32 %v1895_v10, 0.0  ;;  %v1882_v24 = vmax.f32 %v1880_v56, %v1881_v47  ;;  %v2147_v26 = vmax.f32 %v2130_v60, %v2146_v6  ;;  %v1272_v20 = vpop.f32.mrf.mxu0  ;;  %v4482_v27 = vpop.f32.mrf.mxu1  ;;  %v2404_v2 = vsel %vm2280_vm7, %v2403_v63, %v2402_v44 }
 0x1a6   : > { %v1950_v3 = vsel %vm1691_vm1, %v1948_v12, %v1949_v19  ;;  %v1988_v28 = vadd.f32 %v1949_v19, %v4391_v11  ;;  %v2021_v30 = vrot.slane %v1272_v20, 2 }
 0x1a7   : > { %v1911_v32 = vpack.c.bf16 %v1903_v21, %v1903_v21  ;;  %v1883_v23 = vrot.slane %v1882_v24, 1  ;;  %v2148_v34 = vrot.slane %v2147_v26, 4  ;;  %v1987_v37 = vadd.f32 %v1950_v3, %v4387_v1  ;;  %v1276_v40 = vpop.f32.mrf.mxu0  ;;  %v1389_v41 = vpop.f32.mrf.mxu1 }
 0x1a8   : > { %v2022_v35 = vsel %vm1764_vm2, %v2020_v7, %v2021_v30  ;;  %v2060_v48 = vadd.f32 %v2021_v30, %v1988_v28  ;;  %v2095_v1 = vsel %vm2089_vm5, %v2093_v17, %v2094_v29  ;;  %v1951_v47 = vrot.slane %v1276_v40, 1 }
 0x1a9   : > { %v2395_v49 = vunpack.c.l.b16 %v1911_v32  ;;  %v1884_v11 = vmax.f32 %v1882_v24, %v1883_v23  ;;  %v2149_v50 = vmax.f32 %v2147_v26, %v2148_v34  ;;  %v2059_v51 = vadd.f32 %v2022_v35, %v1987_v37  ;;  %v1278_v58 = vpop.f32.mrf.mxu0  ;;  %v4492_v56 = vpop.f32.mrf.mxu1 }
 0x1aa   : > { %v2133_v61 = vadd.f32 %v2094_v29, %v2060_v48  ;;  %v2096_v12 = vrot.slane %v1389_v41, 3  ;;  %v2023_v13 = vrot.slane %v1278_v58, 2  ;;  %v2406_v37 = vsel %vm2283_vm8, %v2405_v57, %v2404_v2 }
 0x1ab   : > { %v1896_v46 = vadd.f32 %v4433_v9, %v1884_v11  ;;  %v2150_v8 = vrot.slane %v2149_v50, 2  ;;  %v2132_v10 = vadd.f32 %v2095_v1, %v2059_v51  ;;  %v1280_v60 = vpop.f32.mrf.mxu0  ;;  %v1393_v52 = vpop.f32.mrf.mxu1  ;;  %v2407_v6 = vrot.slane %v2395_v49, 2 }
 0x1ac   : > { %v2154_v54 = vsel %vm2089_vm5, %v2133_v61, -inf  ;;  %v1952_v15 = vrot.slane %v1280_v60, 1  ;;  %v2097_v26 = vrot.slane %v1393_v52, 3 }
 0x1ad   : > { %v1904_v19 = vmax.f32 %v1896_v46, 0.0  ;;  %v2151_v16 = vmax.f32 %v2149_v50, %v2150_v8  ;;  %v2155_v21 = vmax.f32 %v2132_v10, %v2154_v54  ;;  %v1282_v17 = vpop.f32.mrf.mxu0  ;;  %v4498_v24 = vpop.f32.mrf.mxu1 }
 0x1ae   : > { %v1953_v63 = vsel %vm1691_vm1, %v1951_v47, %v1952_v15  ;;  %v1990_v9 = vadd.f32 %v1952_v15, %v4402_v39  ;;  %v2024_v7 = vrot.slane %v1282_v17, 2  ;;  %v2098_v49 = vsel %vm2089_vm5, %v2096_v12, %v2097_v26 }
 0x1af   : > { %v1912_v20 = vpack.c.bf16 %v1904_v19, %v1904_v19  ;;  %v2152_v3 = vrot.slane %v2151_v16, 1  ;;  %v2156_v28 = vrot.slane %v2155_v21, 4  ;;  %v1989_v29 = vadd.f32 %v1953_v63, %v4395_v25  ;;  %v1286_v30 = vpop.f32.mrf.mxu0  ;;  %v1399_v32 = vpop.f32.mrf.mxu1 }
 0x1b0   : > { %v2025_v23 = vsel %vm1764_vm2, %v2023_v13, %v2024_v7  ;;  %v2062_v34 = vadd.f32 %v2024_v7, %v1990_v9  ;;  %v2408_v25 = vsel %vm2286_vm9, %v2407_v6, %v2406_v37  ;;  %v1954_v46 = vrot.slane %v1286_v30, 1 }
 0x1b1   : > { %v2396_v40 = vunpack.c.l.b16 %v1912_v20  ;;  %v2153_v41 = vmax.f32 %v2151_v16, %v2152_v3  ;;  %v2157_v35 = vmax.f32 %v2155_v21, %v2156_v28  ;;  %v2061_v48 = vadd.f32 %v2025_v23, %v1989_v29  ;;  %v1288_v44 = vpop.f32.mrf.mxu0  ;;  %v4505_v39 = vpop.f32.mrf.mxu1 }
 0x1b2   : > { %v2135_v11 = vadd.f32 %v2097_v26, %v2062_v34  ;;  %v2099_v8 = vrot.slane %v1399_v32, 3  ;;  %v2026_v52 = vrot.slane %v1288_v44, 2 }
 0x1b3   : > { %v2214_v50 = vadd.f32 %v4488_v43, %v2153_v41  ;;  %v2158_v51 = vrot.slane %v2157_v35, 2  ;;  %v2134_v58 = vadd.f32 %v2098_v49, %v2061_v48  ;;  %v1290_v1 = vpop.f32.mrf.mxu0  ;;  %v1403_v61 = vpop.f32.mrf.mxu1  ;;  %v2409_v57 = vrot.slane %v2396_v40, 1 }
 0x1b4   : > { %v2162_v2 = vsel %vm2089_vm5, %v2135_v11, -inf  ;;  %v1955_v10 = vrot.slane %v1290_v1, 1  ;;  %v2100_v54 = vrot.slane %v1403_v61, 3 }
 0x1b5   : > { %v2159_v47 = vmax.f32 %v2157_v35, %v2158_v51  ;;  %v2163_v60 = vmax.f32 %v2134_v58, %v2162_v2  ;;  %v1292_v12 = vpop.f32.mrf.mxu0  ;;  %v4511_v13 = vpop.f32.mrf.mxu1  ;;  %v2222_v15 = vmax.f32 %v2214_v50, 0.0  ;;  %v2410_v7 = vsel %vm2289_vm10, %v2409_v57, %v2408_v25 }
 0x1b6   : > { %v1956_v6 = vsel %vm1691_vm1, %v1954_v46, %v1955_v10  ;;  %v1992_v19 = vadd.f32 %v1955_v10, %v4411_v4  ;;  %v2027_v16 = vrot.slane %v1292_v12, 2  ;;  %v2101_v4 = vsel %vm2089_vm5, %v2099_v8, %v2100_v54 }
 0x1b7   : > { %v2160_v21 = vrot.slane %v2159_v47, 1  ;;  %v2164_v17 = vrot.slane %v2163_v60, 4  ;;  %v1991_v63 = vadd.f32 %v1956_v6, %v4406_v53  ;;  %v1296_v9 = vpop.f32.mrf.mxu0  ;;  %v1409_v26 = vpop.f32.mrf.mxu1  ;;  %v2411_v37 = vpack.c.b16 %v2410_v7, %v2410_v7 }
 0x1b8   : > { %v2028_v20 = vsel %vm1764_vm2, %v2026_v52, %v2027_v16  ;;  %v2064_v3 = vadd.f32 %v2027_v16, %v1992_v19  ;;  %v2230_v40 = vpack.c.bf16 %v2222_v15, %v2222_v15  ;;  %v1957_v11 = vrot.slane %v1296_v9, 1 }
 0x1b9   : > { %v2161_v28 = vmax.f32 %v2159_v47, %v2160_v21  ;;  %v2165_v29 = vmax.f32 %v2163_v60, %v2164_v17  ;;  %v2063_v30 = vadd.f32 %v2028_v20, %v1991_v63  ;;  %v1298_v32 = vpop.f32.mrf.mxu0  ;;  %v4518_v23 = vpop.f32.mrf.mxu1  ;;  %v2102_v25 = vrot.slane %v1409_v26, 3  ;;  %3498 = vmatmul.mubr.bf16.vlgmr.msra.gmra.mxu1 %v2411_v37 }
 0x1ba   : > { %v2137_v34 = vadd.f32 %v2100_v54, %v2064_v3  ;;  %v2029_v61 = vrot.slane %v1298_v32, 2  ;;  %3537 = vmatprep.mubr.msk.bf16.mxu1 %vm4036_vm0, %v4035_v45 }
 0x1bb   : > { %v2215_v53 = vadd.f32 %v4488_v43, %v2161_v28  ;;  %v2166_v41 = vrot.slane %v2165_v29, 2  ;;  %v2136_v35 = vadd.f32 %v2101_v4, %v2063_v30  ;;  %v1300_v48 = vpop.f32.mrf.mxu0  ;;  %v1413_v44 = vpop.f32.mrf.mxu1 }
 0x1bc   : > { %v2170_v49 = vsel %vm2089_vm5, %v2137_v34, -inf  ;;  %v1958_v50 = vrot.slane %v1300_v48, 1  ;;  %v2103_v10 = vrot.slane %v1413_v44, 3 }
 0x1bd   : > { %v2223_v51 = vmax.f32 %v2215_v53, 0.0  ;;  %v2167_v58 = vmax.f32 %v2165_v29, %v2166_v41  ;;  %v2171_v1 = vmax.f32 %v2136_v35, %v2170_v49  ;;  %v1302_v57 = vpop.f32.mrf.mxu0  ;;  %v4523_v2 = vpop.f32.mrf.mxu1 }
 0x1be   : > { %v1959_v46 = vsel %vm1691_vm1, %v1957_v11, %v1958_v50  ;;  %v1994_v8 = vadd.f32 %v1958_v50, %v4422_v38  ;;  %v2030_v47 = vrot.slane %v1302_v57, 2  ;;  %v2262_v38 = vunpack.c.l.b16 %v2230_v40 }
 0x1bf   : > { %v2231_v60 = vpack.c.bf16 %v2223_v51, %v2223_v51  ;;  %v2168_v52 = vrot.slane %v2167_v58, 1  ;;  %v2172_v54 = vrot.slane %v2171_v1, 4  ;;  %v1993_v12 = vadd.f32 %v1959_v46, %v4415_v22  ;;  %v1306_v15 = vpop.f32.mrf.mxu0  ;;  %v1419_v6 = vpop.f32.mrf.mxu1 }
 0x1c0   : > { %v2031_v19 = vsel %vm1764_vm2, %v2029_v61, %v2030_v47  ;;  %v2066_v16 = vadd.f32 %v2030_v47, %v1994_v8  ;;  %v2104_v20 = vsel %vm2089_vm5, %v2102_v25, %v2103_v10  ;;  %v1960_v28 = vrot.slane %v1306_v15, 1 }
 0x1c1   : > { %v2263_v21 = vunpack.c.l.b16 %v2231_v60  ;;  %v2169_v17 = vmax.f32 %v2167_v58, %v2168_v52  ;;  %v2173_v63 = vmax.f32 %v2171_v1, %v2172_v54  ;;  %v2065_v9 = vadd.f32 %v2031_v19, %v1993_v12  ;;  %v1308_v26 = vpop.f32.mrf.mxu0  ;;  %v4531_v7 = vpop.f32.mrf.mxu1 }
 0x1c2   : > { %v2139_v3 = vadd.f32 %v2103_v10, %v2066_v16  ;;  %v2105_v53 = vrot.slane %v1419_v6, 3  ;;  %v2032_v41 = vrot.slane %v1308_v26, 2 }
 0x1c3   : > { %v2270_v29 = vrot.slane %v2263_v21, 7  ;;  %v2216_v22 = vadd.f32 %v4488_v43, %v2169_v17  ;;  %v2174_v30 = vrot.slane %v2173_v63, 2  ;;  %v2138_v32 = vadd.f32 %v2104_v20, %v2065_v9  ;;  %v1310_v4 = vpop.f32.mrf.mxu0  ;;  %v1423_v34 = vpop.f32.mrf.mxu1 }
 0x1c4   : > { %v2178_v37 = vsel %vm2089_vm5, %v2139_v3, -inf  ;;  %v1961_v35 = vrot.slane %v1310_v4, 1  ;;  %v2106_v58 = vrot.slane %v1423_v34, 3 }
 0x1c5   : > { %v2272_v48 = vsel %vm2271_vm3, %v2270_v29, %v2262_v38  ;;  %v2224_v44 = vmax.f32 %v2216_v22, 0.0  ;;  %v2175_v40 = vmax.f32 %v2173_v63, %v2174_v30  ;;  %v2179_v49 = vmax.f32 %v2138_v32, %v2178_v37  ;;  %v1312_v11 = vpop.f32.mrf.mxu0  ;;  %v4537_v25 = vpop.f32.mrf.mxu1 }
 0x1c6   : > { %v1962_v50 = vsel %vm1691_vm1, %v1960_v28, %v1961_v35  ;;  %v1996_v51 = vadd.f32 %v1961_v35, %v4435_v14  ;;  %v2033_v1 = vrot.slane %v1312_v11, 2  ;;  %v2107_v14 = vsel %vm2089_vm5, %v2105_v53, %v2106_v58 }
 0x1c7   : > { %v2232_v61 = vpack.c.bf16 %v2224_v44, %v2224_v44  ;;  %v2176_v57 = vrot.slane %v2175_v40, 1  ;;  %v2180_v46 = vrot.slane %v2179_v49, 4  ;;  %v1995_v8 = vadd.f32 %v1962_v50, %v4426_v0  ;;  %v1316_v10 = vpop.f32.mrf.mxu0  ;;  %v1429_v47 = vpop.f32.mrf.mxu1 }
 0x1c8   : > { %v2034_v60 = vsel %vm1764_vm2, %v2032_v41, %v2033_v1  ;;  %v2068_v52 = vadd.f32 %v2033_v1, %v1996_v51  ;;  %v1963_v17 = vrot.slane %v1316_v10, 1  ;;  %v2108_v28 = vrot.slane %v1429_v47, 3 }
 0x1c9   : > { %v2264_v54 = vunpack.c.l.b16 %v2232_v61  ;;  %v2177_v12 = vmax.f32 %v2175_v40, %v2176_v57  ;;  %v2181_v15 = vmax.f32 %v2179_v49, %v2180_v46  ;;  %v2067_v6 = vadd.f32 %v2034_v60, %v1995_v8  ;;  %v1318_v19 = vpop.f32.mrf.mxu0  ;;  %v4543_v16 = vpop.f32.mrf.mxu1 }
 0x1ca   : > { %v2141_v21 = vadd.f32 %v2106_v58, %v2068_v52  ;;  %v2035_v29 = vrot.slane %v1318_v19, 2 }
 0x1cb   : > { %v2273_v63 = vrot.slane %v2264_v54, 6  ;;  %v2217_v9 = vadd.f32 %v4488_v43, %v2177_v12  ;;  %v2182_v0 = vrot.slane %v2181_v15, 2  ;;  %v2140_v26 = vadd.f32 %v2107_v14, %v2067_v6  ;;  %v1320_v38 = vpop.f32.mrf.mxu0  ;;  %v1433_v20 = vpop.f32.mrf.mxu1 }
 0x1cc   : > { %v2186_v3 = vsel %vm2089_vm5, %v2141_v21, -inf  ;;  %v1964_v22 = vrot.slane %v1320_v38, 1  ;;  %v2109_v44 = vrot.slane %v1433_v20, 3 }
 0x1cd   : > { %v2275_v30 = vsel %vm2274_vm4, %v2273_v63, %v2272_v48  ;;  %v2225_v32 = vmax.f32 %v2217_v9, 0.0  ;;  %v2183_v4 = vmax.f32 %v2181_v15, %v2182_v0  ;;  %v2187_v34 = vmax.f32 %v2140_v26, %v2186_v3  ;;  %v1322_v37 = vpop.f32.mrf.mxu0  ;;  %v4549_v53 = vpop.f32.mrf.mxu1 }
 0x1ce   : > { %v1965_v41 = vsel %vm1691_vm1, %v1963_v17, %v1964_v22  ;;  %v1998_v35 = vadd.f32 %v1964_v22, %v4446_v55  ;;  %v2036_v40 = vrot.slane %v1322_v37, 2  ;;  %v2110_v55 = vsel %vm2089_vm5, %v2108_v28, %v2109_v44 }
 0x1cf   : > { %v2233_v49 = vpack.c.bf16 %v2225_v32, %v2225_v32  ;;  %v2184_v11 = vrot.slane %v2183_v4, 1  ;;  %v2188_v50 = vrot.slane %v2187_v34, 4  ;;  %v1997_v51 = vadd.f32 %v1965_v41, %v4440_v36  ;;  %v1326_v58 = vpop.f32.mrf.mxu0  ;;  %v1439_v1 = vpop.f32.mrf.mxu1 }
 0x1d0   : > { %v2037_v48 = vsel %vm1764_vm2, %v2035_v29, %v2036_v40  ;;  %v2070_v61 = vadd.f32 %v2036_v40, %v1998_v35  ;;  %v1966_v54 = vrot.slane %v1326_v58, 1  ;;  %v2111_v17 = vrot.slane %v1439_v1, 3 }
 0x1d1   : > { %v2265_v57 = vunpack.c.l.b16 %v2233_v49  ;;  %v2185_v46 = vmax.f32 %v2183_v4, %v2184_v11  ;;  %v2189_v8 = vmax.f32 %v2187_v34, %v2188_v50  ;;  %v2069_v10 = vadd.f32 %v2037_v48, %v1997_v51  ;;  %v1328_v47 = vpop.f32.mrf.mxu0  ;;  %v4555_v60 = vpop.f32.mrf.mxu1 }
 0x1d2   : > { %v2143_v52 = vadd.f32 %v2109_v44, %v2070_v61  ;;  %v2038_v63 = vrot.slane %v1328_v47, 2 }
 0x1d3   : > { %v2276_v12 = vrot.slane %v2265_v57, 5  ;;  %v2218_v15 = vadd.f32 %v4488_v43, %v2185_v46  ;;  %v2190_v36 = vrot.slane %v2189_v8, 2  ;;  %v2142_v6 = vadd.f32 %v2110_v55, %v2069_v10  ;;  %v1330_v19 = vpop.f32.mrf.mxu0  ;;  %v1443_v14 = vpop.f32.mrf.mxu1 }
 0x1d4   : > { %v2194_v21 = vsel %vm2089_vm5, %v2143_v52, -inf  ;;  %v1967_v9 = vrot.slane %v1330_v19, 1  ;;  %v2112_v32 = vrot.slane %v1443_v14, 3  ;;  %v2856_v46 = vsub.s32 2, %v4420_v33 }
 0x1d5   : > { %v2226_v0 = vmax.f32 %v2218_v15, 0.0  ;;  %v2191_v26 = vmax.f32 %v2189_v8, %v2190_v36  ;;  %v2195_v38 = vmax.f32 %v2142_v6, %v2194_v21  ;;  %v1332_v20 = vpop.f32.mrf.mxu0  ;;  %v4560_v3 = vpop.f32.mrf.mxu1  ;;  %v2278_v28 = vsel %vm2277_vm6, %v2276_v12, %v2275_v30 }
 0x1d6   : > { %v1968_v29 = vsel %vm1691_vm1, %v1966_v54, %v1967_v9  ;;  %v2000_v22 = vadd.f32 %v1967_v9, %v4458_v42  ;;  %v2039_v4 = vrot.slane %v1332_v20, 2  ;;  %v2113_v42 = vsel %vm2089_vm5, %v2111_v17, %v2112_v32 }
 0x1d7   : > { %v2234_v34 = vpack.c.bf16 %v2226_v0, %v2226_v0  ;;  %v2192_v37 = vrot.slane %v2191_v26, 1  ;;  %v2196_v41 = vrot.slane %v2195_v38, 4  ;;  %v1999_v35 = vadd.f32 %v1968_v29, %v4449_v18  ;;  %v1482_v44 = vpop.f32.mrf.mxu0  ;;  %v1595_v40 = vpop.f32.mrf.mxu1 }
 0x1d8   : > { %v2040_v49 = vsel %vm1764_vm2, %v2038_v63, %v2039_v4  ;;  %v2072_v11 = vadd.f32 %v2039_v4, %v2000_v22  ;;  %v2517_v57 = vrot.slane %v1482_v44, 1  ;;  %v2661_v12 = vrot.slane %v1595_v40, 3 }
 0x1d9   : > { %v2266_v50 = vunpack.c.l.b16 %v2234_v34  ;;  %v2193_v51 = vmax.f32 %v2191_v26, %v2192_v37  ;;  %v2197_v30 = vmax.f32 %v2195_v38, %v2196_v41  ;;  %v2071_v58 = vadd.f32 %v2040_v49, %v1999_v35  ;;  %v1484_v1 = vpop.f32.mrf.mxu0  ;;  %v1597_v48 = vpop.f32.mrf.mxu1 }
 0x1da   : > { %v2145_v61 = vadd.f32 %v2112_v32, %v2072_v11  ;;  %v2589_v15 = vrot.slane %v1484_v1, 2  ;;  %v2734_v37 = vrot.slane %v1597_v48, 4 }
 0x1db   : > { %v2279_v8 = vrot.slane %v2266_v50, 4  ;;  %v2219_v18 = vadd.f32 %v4488_v43, %v2193_v51  ;;  %v2198_v10 = vrot.slane %v2197_v30, 2  ;;  %v2144_v47 = vadd.f32 %v2113_v42, %v2071_v58  ;;  %v1486_v55 = vpop.f32.mrf.mxu0  ;;  %v1599_v52 = vpop.f32.mrf.mxu1 }
 0x1dc   : > { %v2202_v54 = vsel %vm2089_vm5, %v2145_v61, -inf  ;;  %v2518_v36 = vrot.slane %v1486_v55, 1  ;;  %v2662_v26 = vrot.slane %v1599_v52, 3 }
 0x1dd   : > { %v2227_v6 = vmax.f32 %v2219_v18, 0.0  ;;  %v2199_v19 = vmax.f32 %v2197_v30, %v2198_v10  ;;  %v2203_v14 = vmax.f32 %v2144_v47, %v2202_v54  ;;  %v1488_v21 = vpop.f32.mrf.mxu0  ;;  %v1601_v17 = vpop.f32.mrf.mxu1  ;;  %v2281_v63 = vsel %vm2280_vm7, %v2279_v8, %v2278_v28 }
 0x1de   : > { %v2519_v9 = vsel %vm1691_vm1, %v2517_v57, %v2518_v36  ;;  %v2558_v0 = vadd.f32 %v2518_v36, %v4468_v31  ;;  %v2590_v38 = vrot.slane %v1488_v21, 2  ;;  %v2735_v44 = vrot.slane %v1601_v17, 4 }
 0x1df   : > { %v2235_v20 = vpack.c.bf16 %v2227_v6, %v2227_v6  ;;  %v2200_v29 = vrot.slane %v2199_v19, 1  ;;  %v2204_v22 = vrot.slane %v2203_v14, 4  ;;  %v2557_v32 = vadd.f32 %v2519_v9, %v4462_v5  ;;  %v1492_v4 = vpop.f32.mrf.mxu0  ;;  %v1605_v34 = vpop.f32.mrf.mxu1 }
 0x1e0   : > { %v2591_v41 = vsel %vm1764_vm2, %v2589_v15, %v2590_v38  ;;  %v2630_v35 = vadd.f32 %v2590_v38, %v2558_v0  ;;  %v2663_v51 = vsel %vm2089_vm5, %v2661_v12, %v2662_v26  ;;  %v2736_v58 = vsel %vm2733_vm11, %v2734_v37, %v2735_v44 }
 0x1e1   : > { %v2267_v40 = vunpack.c.l.b16 %v2235_v20  ;;  %v2201_v28 = vmax.f32 %v2199_v19, %v2200_v29  ;;  %v2205_v49 = vmax.f32 %v2203_v14, %v2204_v22  ;;  %v2629_v11 = vadd.f32 %v2591_v41, %v2557_v32  ;;  %v1494_v50 = vpop.f32.mrf.mxu0  ;;  %v1607_v31 = vpop.f32.mrf.mxu1 }
 0x1e2   : > { %v2702_v30 = vadd.f32 %v2662_v26, %v2630_v35  ;;  %v2520_v1 = vrot.slane %v1492_v4, 1  ;;  %v2664_v10 = vrot.slane %v1605_v34, 3  ;;  %v4587_v29 = vrot.slane %v4428_v59, %v2856_v46 }
 0x1e3   : > { %v2282_v5 = vrot.slane %v2267_v40, 3  ;;  %v2220_v42 = vadd.f32 %v4488_v43, %v2201_v28  ;;  %v2206_v48 = vrot.slane %v2205_v49, 2  ;;  %v2701_v61 = vadd.f32 %v2663_v51, %v2629_v11  ;;  %v1496_v57 = vpop.f32.mrf.mxu0  ;;  %v1609_v8 = vpop.f32.mrf.mxu1 }
 0x1e4   : > { %v2775_v18 = vadd.f32 %v2735_v44, %v2702_v30  ;;  %v2521_v47 = vrot.slane %v1496_v57, 1  ;;  %v2665_v55 = vrot.slane %v1609_v8, 3  ;;  %v2592_v22 = vrot.slane %v1494_v50, 2 }
 0x1e5   : > { %v2228_v52 = vmax.f32 %v2220_v42, 0.0  ;;  %v2207_v54 = vmax.f32 %v2205_v49, %v2206_v48  ;;  %v2774_v15 = vadd.f32 %v2736_v58, %v2701_v61  ;;  %v1498_v36 = vpop.f32.mrf.mxu0  ;;  %v1611_v12 = vpop.f32.mrf.mxu1  ;;  %v2284_v6 = vsel %vm2283_vm8, %v2282_v5, %v2281_v63 }
 0x1e6   : > { %v2790_v19 = vsel %vm2733_vm11, %v2775_v18, -inf  ;;  %v2522_v14 = vsel %vm1691_vm1, %v2520_v1, %v2521_v47  ;;  %v2560_v21 = vadd.f32 %v2521_v47, %v4482_v27  ;;  %v2737_v63 = vrot.slane %v1607_v31, 4 }
 0x1e7   : > { %v2236_v17 = vpack.c.bf16 %v2228_v52, %v2228_v52  ;;  %v2208_v9 = vrot.slane %v2207_v54, 1  ;;  %v2791_v0 = vmax.f32 %v2774_v15, %v2790_v19  ;;  %v2559_v26 = vadd.f32 %v2522_v14, %v4477_v62  ;;  %v1502_v38 = vpop.f32.mrf.mxu0  ;;  %v1615_v20 = vpop.f32.mrf.mxu1 }
 0x1e8   : > { %v2593_v32 = vrot.slane %v1498_v36, 2  ;;  %v2666_v27 = vsel %vm2089_vm5, %v2664_v10, %v2665_v55  ;;  %v2738_v40 = vrot.slane %v1611_v12, 4  ;;  %v2523_v28 = vrot.slane %v1502_v38, 1 }
 0x1e9   : > { %v2268_v4 = vunpack.c.l.b16 %v2236_v17  ;;  %v2209_v34 = vmax.f32 %v2207_v54, %v2208_v9  ;;  %v2792_v37 = vrot.slane %v2791_v0, 4  ;;  %v1504_v41 = vpop.f32.mrf.mxu0  ;;  %v1617_v35 = vpop.f32.mrf.mxu1  ;;  %v2667_v51 = vrot.slane %v1615_v20, 3 }
 0x1ea   : > { %v2594_v44 = vsel %vm1764_vm2, %v2592_v22, %v2593_v32  ;;  %v2632_v62 = vadd.f32 %v2593_v32, %v2560_v21  ;;  %v2739_v8 = vsel %vm2733_vm11, %v2737_v63, %v2738_v40  ;;  %v2595_v19 = vrot.slane %v1504_v41, 2 }
 0x1eb   : > { %v2285_v49 = vrot.slane %v2268_v4, 2  ;;  %v2221_v33 = vadd.f32 %v4488_v43, %v2209_v34  ;;  %v2793_v59 = vmax.f32 %v2791_v0, %v2792_v37  ;;  %v2631_v46 = vadd.f32 %v2594_v44, %v2559_v26  ;;  %v1506_v11 = vpop.f32.mrf.mxu0  ;;  %v1619_v50 = vpop.f32.mrf.mxu1 }
 0x1ec   : > { %v2704_v31 = vadd.f32 %v2665_v55, %v2632_v62  ;;  %v2524_v30 = vrot.slane %v1506_v11, 1  ;;  %v2668_v58 = vrot.slane %v1619_v50, 3  ;;  %v2740_v9 = vrot.slane %v1617_v35, 4 }
 0x1ed   : > { %v2229_v1 = vmax.f32 %v2221_v33, 0.0  ;;  %v2794_v5 = vrot.slane %v2793_v59, 2  ;;  %v2703_v42 = vadd.f32 %v2666_v27, %v2631_v46  ;;  %v1508_v48 = vpop.f32.mrf.mxu0  ;;  %v1621_v61 = vpop.f32.mrf.mxu1  ;;  %v4593_v57 = vsel %vm2286_vm9, %v2285_v49, %v2284_v6 }
 0x1ee   : > { %v2777_v18 = vadd.f32 %v2738_v40, %v2704_v31  ;;  %v2525_v43 = vsel %vm1691_vm1, %v2523_v28, %v2524_v30  ;;  %v2562_v10 = vadd.f32 %v2524_v30, %v4498_v24  ;;  %v2596_v14 = vrot.slane %v1508_v48, 2 }
 0x1ef   : > { %v2237_v47 = vpack.c.bf16 %v2229_v1, %v2229_v1  ;;  %v2795_v55 = vmax.f32 %v2793_v59, %v2794_v5  ;;  %v2776_v52 = vadd.f32 %v2739_v8, %v2703_v42  ;;  %v2561_v54 = vadd.f32 %v2525_v43, %v4492_v56  ;;  %v1512_v15 = vpop.f32.mrf.mxu0  ;;  %v1625_v36 = vpop.f32.mrf.mxu1 }
 0x1f0   : > { %v2798_v12 = vsel %vm2733_vm11, %v2777_v18, -inf  ;;  %v2741_v6 = vrot.slane %v1621_v61, 4  ;;  %v2669_v0 = vsel %vm2089_vm5, %v2667_v51, %v2668_v58  ;;  %v2597_v20 = vsel %vm1764_vm2, %v2595_v19, %v2596_v14 }
 0x1f1   : > { %v2796_v21 = vrot.slane %v2795_v55, 1  ;;  %v2799_v17 = vmax.f32 %v2776_v52, %v2798_v12  ;;  %v1514_v26 = vpop.f32.mrf.mxu0  ;;  %v1627_v38 = vpop.f32.mrf.mxu1  ;;  %v2269_v24 = vunpack.c.l.b16 %v2237_v47  ;;  %v2634_v22 = vadd.f32 %v2596_v14, %v2562_v10 }
 0x1f2   : > { %v2526_v63 = vrot.slane %v1512_v15, 1  ;;  %v2633_v4 = vadd.f32 %v2597_v20, %v2561_v54  ;;  %v2670_v34 = vrot.slane %v1625_v36, 3  ;;  %v2742_v44 = vsel %vm2733_vm11, %v2740_v9, %v2741_v6 }
 0x1f3   : > { %v2797_v56 = vmax.f32 %v2795_v55, %v2796_v21  ;;  %v2800_v32 = vrot.slane %v2799_v17, 4  ;;  %v1516_v37 = vpop.f32.mrf.mxu0  ;;  %v1629_v27 = vpop.f32.mrf.mxu1  ;;  %v2706_v41 = vadd.f32 %v2668_v58, %v2634_v22  ;;  %v2598_v62 = vrot.slane %v1514_v26, 2 }
 0x1f4   : > { %v2527_v35 = vrot.slane %v1516_v37, 1  ;;  %v2705_v49 = vadd.f32 %v2669_v0, %v2633_v4  ;;  %v2671_v33 = vrot.slane %v1629_v27, 3  ;;  %v2288_v51 = vrot.slane %v2269_v24, 1  ;;  %v3803_v0 = vld [vmem:[#allocation8 + $0xb8] sm:$0xff]  }
 0x1f5   : > { %v2858_v40 = vadd.f32 %v4587_v29, %v2797_v56  ;;  %v2801_v28 = vmax.f32 %v2799_v17, %v2800_v32  ;;  %v1518_v59 = vpop.f32.mrf.mxu0  ;;  %v1631_v46 = vpop.f32.mrf.mxu1  ;;  %v2779_v11 = vadd.f32 %v2741_v6, %v2706_v41  ;;  %v2743_v8 = vrot.slane %v1627_v38, 4 }
 0x1f6   : > { %v2528_v50 = vsel %vm1691_vm1, %v2526_v63, %v2527_v35  ;;  %v2564_v31 = vadd.f32 %v2527_v35, %v4511_v13  ;;  %v2778_v58 = vadd.f32 %v2742_v44, %v2705_v49  ;;  %v2599_v18 = vrot.slane %v1518_v59, 2 }
 0x1f7   : > { %v2866_v30 = vmax.f32 %v2858_v40, 0.0  ;;  %v2802_v1 = vrot.slane %v2801_v28, 2  ;;  %v2563_v5 = vadd.f32 %v2528_v50, %v4505_v39  ;;  %v1522_v42 = vpop.f32.mrf.mxu0  ;;  %v1635_v48 = vpop.f32.mrf.mxu1  ;;  %v2806_v61 = vsel %vm2733_vm11, %v2779_v11, -inf }
 0x1f8   : > { %v2744_v43 = vrot.slane %v1631_v46, 4  ;;  %v2807_v47 = vmax.f32 %v2778_v58, %v2806_v61  ;;  %v2672_v55 = vsel %vm2089_vm5, %v2670_v34, %v2671_v33  ;;  %v2529_v52 = vrot.slane %v1522_v42, 1 }
 0x1f9   : > { %v2803_v10 = vmax.f32 %v2801_v28, %v2802_v1  ;;  %v1524_v54 = vpop.f32.mrf.mxu0  ;;  %v1637_v13 = vpop.f32.mrf.mxu1  ;;  %v4609_v15 = vpack.c.bf16 %v2866_v30, %v2866_v30  ;;  %v2600_v36 = vsel %vm1764_vm2, %v2598_v62, %v2599_v18  ;;  %v2636_v12 = vadd.f32 %v2599_v18, %v2564_v31 }
 0x1fa   : > { %v2290_v39 = vsel %vm2289_vm10, %v2288_v51, %v4593_v57  ;;  %v2808_v14 = vrot.slane %v2807_v47, 4  ;;  %v2635_v6 = vadd.f32 %v2600_v36, %v2563_v5  ;;  %v2673_v21 = vrot.slane %v1635_v48, 3 }
 0x1fb   : > { %v2804_v19 = vrot.slane %v2803_v10, 1  ;;  %v1526_v17 = vpop.f32.mrf.mxu0  ;;  %v1639_v9 = vpop.f32.mrf.mxu1  ;;  %v2708_v26 = vadd.f32 %v2671_v33, %v2636_v12  ;;  %v2745_v38 = vsel %vm2733_vm11, %v2743_v8, %v2744_v43  ;;  %v2291_v24 = vpack.c.b16 %v2290_v39, %v2290_v39  ;;  %v3804_v33 = vld [vmem:[#allocation8 + $0xb0] sm:$0xff]  }
 0x1fc   : > { %v2601_v20 = vrot.slane %v1524_v54, 2  ;;  %v2809_v63 = vmax.f32 %v2807_v47, %v2808_v14  ;;  %v2707_v56 = vadd.f32 %v2672_v55, %v2635_v6  ;;  %v2530_v32 = vrot.slane %v1526_v17, 1  ;;  %v3805_v55 = vld [vmem:[#allocation8 + $0xa8] sm:$0xff]  }
 0x1fd   : > { %v2805_v22 = vmax.f32 %v2803_v10, %v2804_v19  ;;  %v1528_v4 = vpop.f32.mrf.mxu0  ;;  %v1641_v34 = vpop.f32.mrf.mxu1  ;;  %v2781_v37 = vadd.f32 %v2744_v43, %v2708_v26  ;;  %3478 = vmatmul.mubr.bf16.vlgmr.msra.gmra.mxu0 %v2291_v24  ;;  %v2674_v57 = vrot.slane %v1639_v9, 3  ;;  %v2746_v46 = vrot.slane %v1637_v13, 4 }
 0x1fe   : > { %v2602_v27 = vrot.slane %v1528_v4, 2  ;;  %v2747_v41 = vrot.slane %v1641_v34, 4  ;;  %v2810_v62 = vrot.slane %v2809_v63, 2  ;;  %v2780_v35 = vadd.f32 %v2745_v38, %v2707_v56  ;;  %3502 = vmatpush3.bf16.msra.mxu0 %v3803_v0  ;;  %3517 = vmatprep.mubr.msk.bf16.mxu0 %vm4036_vm0, %v4035_v45  ;;  %v3806_v56 = vld [vmem:[#allocation8 + $0xa0] sm:$0xff]  }
 0x1ff   : > { %v2859_v44 = vadd.f32 %v4587_v29, %v2805_v22  ;;  %v2531_v40 = vsel %vm1691_vm1, %v2529_v52, %v2530_v32  ;;  %v1532_v28 = vpop.f32.mrf.mxu0  ;;  %v4617_v49 = vpop.f32.mrf.mxu1  ;;  %v2814_v59 = vsel %vm2733_vm11, %v2781_v37, -inf  ;;  %v2566_v50 = vadd.f32 %v2530_v32, %v4523_v2  ;;  %3503 = vmatprep.subr.bf16.mxu0 %v4035_v45 }
 0x200   : > { %v2565_v11 = vadd.f32 %v2531_v40, %v4518_v23  ;;  %v2811_v51 = vmax.f32 %v2809_v63, %v2810_v62  ;;  %v2815_v30 = vmax.f32 %v2780_v35, %v2814_v59  ;;  %v2603_v1 = vsel %vm1764_vm2, %v2601_v20, %v2602_v27 }
 0x201   : > { %v2867_v31 = vmax.f32 %v2859_v44, 0.0  ;;  %v1534_v58 = vpop.f32.mrf.mxu0  ;;  %v4626_v5 = vpop.f32.mrf.mxu1  ;;  %v2906_v42 = vunpack.c.l.b16 %v4609_v15  ;;  %v2675_v48 = vsel %vm2089_vm5, %v2673_v21, %v2674_v57  ;;  %v2638_v8 = vadd.f32 %v2602_v27, %v2566_v50  ;;  %v3807_v50 = vld [vmem:[#allocation8 + $0x98] sm:$0xff]  }
 0x202   : > { %v2637_v61 = vadd.f32 %v2603_v1, %v2565_v11  ;;  %v2812_v23 = vrot.slane %v2811_v51, 1  ;;  %v2816_v43 = vrot.slane %v2815_v30, 4  ;;  %v2748_v2 = vsel %vm2733_vm11, %v2746_v46, %v2747_v41  ;;  %3504 = vmatpush3.bf16.msra.mxu0 %v3804_v33 }
 0x203   : > { %v2875_v18 = vpack.c.bf16 %v2867_v31, %v2867_v31  ;;  %v1536_v10 = vpop.f32.mrf.mxu0  ;;  %v1649_v47 = vpop.f32.mrf.mxu1  ;;  %v2710_v54 = vadd.f32 %v2674_v57, %v2638_v8  ;;  %v2532_v13 = vrot.slane %v1532_v28, 1  ;;  %v2676_v36 = vrot.slane %v4617_v49, 3  ;;  %3505 = vmatprep.subr.bf16.mxu0 %v4035_v45 }
 0x204   : > { %v2709_v52 = vadd.f32 %v2675_v48, %v2637_v61  ;;  %v2813_v12 = vmax.f32 %v2811_v51, %v2812_v23  ;;  %v2817_v39 = vmax.f32 %v2815_v30, %v2816_v43  ;;  %v2533_v19 = vrot.slane %v1536_v10, 1 }
 0x205   : > { %v2907_v15 = vunpack.c.l.b16 %v2875_v18  ;;  %v1538_v14 = vpop.f32.mrf.mxu0  ;;  %v1651_v6 = vpop.f32.mrf.mxu1  ;;  %v2783_v17 = vadd.f32 %v2747_v41, %v2710_v54  ;;  %v2604_v9 = vrot.slane %v1534_v58, 2  ;;  %v2677_v37 = vrot.slane %v1649_v47, 3 }
 0x206   : > { %v2782_v21 = vadd.f32 %v2748_v2, %v2709_v52  ;;  %v2605_v0 = vrot.slane %v1538_v14, 2  ;;  %v2860_v38 = vadd.f32 %v4587_v29, %v2813_v12  ;;  %v2818_v24 = vrot.slane %v2817_v39, 2  ;;  %3506 = vmatpush3.bf16.msra.mxu0 %v3805_v55 }
 0x207   : > { %v2914_v26 = vrot.slane %v2907_v15, 7  ;;  %v2534_v20 = vsel %vm1691_vm1, %v2532_v13, %v2533_v19  ;;  %v1542_v22 = vpop.f32.mrf.mxu0  ;;  %v4635_v63 = vpop.f32.mrf.mxu1  ;;  %v2822_v32 = vsel %vm2733_vm11, %v2783_v17, -inf  ;;  %v2568_v34 = vadd.f32 %v2533_v19, %v4537_v25  ;;  %3507 = vmatprep.subr.bf16.mxu0 %v4035_v45  ;;  %v3808_v13 = vld [vmem:[#allocation8 + $0x90] sm:$0xff]  }
 0x208   : > { %v2567_v4 = vadd.f32 %v2534_v20, %v4531_v7  ;;  %v2868_v27 = vmax.f32 %v2860_v38, 0.0  ;;  %v2819_v41 = vmax.f32 %v2817_v39, %v2818_v24  ;;  %v2823_v44 = vmax.f32 %v2782_v21, %v2822_v32  ;;  %v3809_v32 = vld [vmem:[#allocation8 + $0x88] sm:$0xff]  }
 0x209   : > { %v4642_v57 = vsel %vm2271_vm3, %v2914_v26, %v2906_v42  ;;  %v1544_v62 = vpop.f32.mrf.mxu0  ;;  %v4644_v35 = vpop.f32.mrf.mxu1  ;;  %v2606_v40 = vsel %vm1764_vm2, %v2604_v9, %v2605_v0  ;;  %v2640_v28 = vadd.f32 %v2605_v0, %v2568_v34  ;;  %v2750_v49 = vrot.slane %v1651_v6, 4 }
 0x20a   : > { %v2876_v33 = vpack.c.bf16 %v2868_v27, %v2868_v27  ;;  %v2820_v7 = vrot.slane %v2819_v41, 1  ;;  %v2824_v59 = vrot.slane %v2823_v44, 4  ;;  %v2639_v25 = vadd.f32 %v2606_v40, %v2567_v4  ;;  %3508 = vmatpush3.bf16.msra.mxu0 %v3806_v56 }
 0x20b   : > { %v1546_v46 = vpop.f32.mrf.mxu0  ;;  %v1659_v11 = vpop.f32.mrf.mxu1  ;;  %v2749_v31 = vrot.slane %v4626_v5, 4  ;;  %v2678_v51 = vsel %vm2089_vm5, %v2676_v36, %v2677_v37  ;;  %v2712_v30 = vadd.f32 %v2677_v37, %v2640_v28  ;;  %3509 = vmatprep.subr.bf16.mxu0 %v4035_v45  ;;  %v2535_v48 = vrot.slane %v1542_v22, 1 }
 0x20c   : > { %v2821_v1 = vmax.f32 %v2819_v41, %v2820_v7  ;;  %v2825_v58 = vmax.f32 %v2823_v44, %v2824_v59  ;;  %v2711_v42 = vadd.f32 %v2678_v51, %v2639_v25  ;;  %v2679_v43 = vrot.slane %v4635_v63, 3 }
 0x20d   : > { %v1548_v61 = vpop.f32.mrf.mxu0  ;;  %v1661_v8 = vpop.f32.mrf.mxu1  ;;  %v2751_v18 = vsel %vm2733_vm11, %v2749_v31, %v2750_v49  ;;  %v2785_v23 = vadd.f32 %v2750_v49, %v2712_v30  ;;  %v2536_v2 = vrot.slane %v1546_v46, 1  ;;  %v2908_v10 = vunpack.c.l.b16 %v2876_v33 }
 0x20e   : > { %v2861_v5 = vadd.f32 %v4587_v29, %v2821_v1  ;;  %v2826_v47 = vrot.slane %v2825_v58, 2  ;;  %v2784_v55 = vadd.f32 %v2751_v18, %v2711_v42  ;;  %3510 = vmatpush3.bf16.msra.mxu0 %v3807_v50  ;;  %v2680_v39 = vrot.slane %v1659_v11, 3  ;;  %v3810_v50 = vld [vmem:[#allocation8 + $0x80] sm:$0xff]  }
 0x20f   : > { %v1552_v52 = vpop.f32.mrf.mxu0  ;;  %v4653_v54 = vpop.f32.mrf.mxu1  ;;  %v2830_v36 = vsel %vm2733_vm11, %v2785_v23, -inf  ;;  %v2537_v15 = vsel %vm1691_vm1, %v2535_v48, %v2536_v2  ;;  %v2570_v12 = vadd.f32 %v2536_v2, %v4549_v53  ;;  %3511 = vmatprep.subr.bf16.mxu0 %v4035_v45  ;;  %v2607_v0 = vrot.slane %v1544_v62, 2 }
 0x210   : > { %v2869_v19 = vmax.f32 %v2861_v5, 0.0  ;;  %v2831_v14 = vmax.f32 %v2784_v55, %v2830_v36  ;;  %v2569_v6 = vadd.f32 %v2537_v15, %v4543_v16  ;;  %v2827_v9 = vmax.f32 %v2825_v58, %v2826_v47 }
 0x211   : > { %v1554_v21 = vpop.f32.mrf.mxu0  ;;  %v1667_v17 = vpop.f32.mrf.mxu1  ;;  %v2752_v26 = vrot.slane %v4644_v35, 4  ;;  %v2608_v38 = vrot.slane %v1548_v61, 2  ;;  %v2916_v24 = vrot.slane %v2908_v10, 6  ;;  %v2753_v63 = vrot.slane %v1661_v8, 4 }
 0x212   : > { %v2877_v20 = vpack.c.bf16 %v2869_v19, %v2869_v19  ;;  %v2832_v22 = vrot.slane %v2831_v14, 4  ;;  %3512 = vmatpush3.bf16.msra.mxu0 %v3808_v13  ;;  %v2681_v4 = vsel %vm2089_vm5, %v2679_v43, %v2680_v39  ;;  %v2538_v37 = vrot.slane %v1552_v52, 1 }
 0x213   : > { %v1556_v56 = vpop.f32.mrf.mxu0  ;;  %v1669_v53 = vpop.f32.mrf.mxu1  ;;  %v2609_v34 = vsel %vm1764_vm2, %v2607_v0, %v2608_v38  ;;  %v2642_v16 = vadd.f32 %v2608_v38, %v2570_v12  ;;  %3513 = vmatprep.subr.bf16.mxu0 %v4035_v45  ;;  %v2682_v62 = vrot.slane %v4653_v54, 3  ;;  %v2828_v40 = vrot.slane %v2827_v9, 1 }
 0x214   : > { %v2909_v27 = vunpack.c.l.b16 %v2877_v20  ;;  %v2833_v41 = vmax.f32 %v2831_v14, %v2832_v22  ;;  %v2641_v44 = vadd.f32 %v2609_v34, %v2569_v6  ;;  %v2539_v49 = vrot.slane %v1556_v56, 1 }
 0x215   : > { %v1558_v35 = vpop.f32.mrf.mxu0  ;;  %v2714_v28 = vadd.f32 %v2680_v39, %v2642_v16  ;;  %v2754_v25 = vsel %vm2733_vm11, %v2752_v26, %v2753_v63  ;;  %v2610_v46 = vrot.slane %v1554_v21, 2  ;;  %v1671_v11 = vpop.f32.mrf.mxu1  ;;  %v2683_v1 = vrot.slane %v1669_v53, 3 }
 0x216   : > { %v2611_v33 = vrot.slane %v1558_v35, 2  ;;  %v2834_v7 = vrot.slane %v2833_v41, 2  ;;  %v2713_v59 = vadd.f32 %v2681_v4, %v2641_v44  ;;  %3514 = vmatpush3.bf16.msra.mxu0 %v3809_v32  ;;  %v2540_v51 = vsel %vm1691_vm1, %v2538_v37, %v2539_v49 }
 0x217   : > { %v2787_v31 = vadd.f32 %v2753_v63, %v2714_v28  ;;  %v2572_v30 = vadd.f32 %v2539_v49, %v4560_v3  ;;  %3515 = vmatprep.subr.bf16.mxu0 %v4035_v45  ;;  %v2918_v58 = vrot.slane %v2909_v27, 5  ;;  %v2571_v61 = vadd.f32 %v2540_v51, %v4555_v60 }
 0x218   : > { %v2835_v42 = vmax.f32 %v2833_v41, %v2834_v7  ;;  %v2786_v48 = vadd.f32 %v2754_v25, %v2713_v59  ;;  %v2612_v18 = vsel %vm1764_vm2, %v2610_v46, %v2611_v33  ;;  %v2756_v43 = vrot.slane %v1671_v11, 4 }
 0x219   : > { %v2838_v8 = vsel %vm2733_vm11, %v2787_v31, -inf  ;;  %v2644_v23 = vadd.f32 %v2611_v33, %v2572_v30  ;;  %v2643_v5 = vadd.f32 %v2612_v18, %v2571_v61  ;;  %v2755_v47 = vrot.slane %v1667_v17, 4  ;;  %v3816_v61 = vld [vmem:[#allocation10 + $0x10] sm:$0xff]  }
 0x21a   : > { %v2836_v2 = vrot.slane %v2835_v42, 1  ;;  %v2839_v10 = vmax.f32 %v2786_v48, %v2838_v8  ;;  %3516 = vmatpush3.bf16.msra.mxu0 %v3810_v50  ;;  %v2684_v3 = vsel %vm2089_vm5, %v2682_v62, %v2683_v1  ;;  %v2917_v52 = vsel %vm2274_vm4, %v2916_v24, %v4642_v57  ;;  %v3815_v48 = vld [vmem:[#allocation10 + $0x18] sm:$0xff]  }
 0x21b   : > { %v2716_v55 = vadd.f32 %v2683_v1, %v2644_v23  ;;  %v2715_v13 = vadd.f32 %v2684_v3, %v2643_v5  ;;  %v2829_v60 = vmax.f32 %v2827_v9, %v2828_v40  ;;  %v2757_v36 = vsel %vm2733_vm11, %v2755_v47, %v2756_v43  ;;  %v3811_v1 = vld [vmem:[#allocation10 + $0x38] sm:$0xff]  }
 0x21c   : > { %v2840_v54 = vrot.slane %v2839_v10, 4  ;;  %v2919_v12 = vsel %vm2277_vm6, %v2918_v58, %v2917_v52  ;;  %v2837_v39 = vmax.f32 %v2835_v42, %v2836_v2  ;;  %3522 = vmatpush3.bf16.msra.mxu1 %v3811_v1  ;;  %v3813_v58 = vld [vmem:[#allocation10 + $0x28] sm:$0xff]   ;;  %v3814_v42 = vld [vmem:[#allocation10 + $0x20] sm:$0xff]  }
 0x21d   : > { %v2789_v15 = vadd.f32 %v2756_v43, %v2716_v55  ;;  %v2788_v14 = vadd.f32 %v2757_v36, %v2715_v13  ;;  %v2862_v0 = vadd.f32 %v4587_v29, %v2829_v60  ;;  %3523 = vmatprep.subr.bf16.mxu1 %v4035_v45  ;;  %v3817_v2 = vld [vmem:[#allocation10 + $0x8] sm:$0xff]   ;;  %v3409_v13 = vld [vmem:[%s4751_s4] ss:$0 sm:$0xff] }
 0x21e   : > { %v2841_v19 = vmax.f32 %v2839_v10, %v2840_v54  ;;  %v2863_v26 = vadd.f32 %v4587_v29, %v2837_v39  ;;  %v3818_v10 = vld [vmem:[#allocation10] sm:$0xff]  }
 0x21f   : > { %v2846_v6 = vsel %vm2733_vm11, %v2789_v15, -inf  ;;  %v2870_v20 = vmax.f32 %v2862_v0, 0.0 }
 0x220   : > { %v2842_v21 = vrot.slane %v2841_v19, 2  ;;  %v2847_v17 = vmax.f32 %v2788_v14, %v2846_v6  ;;  %v2871_v22 = vmax.f32 %v2863_v26, 0.0  ;;  %v3410_v14 = vld [vmem:[%s4753_s6] ss:$0 sm:$0xff] }
 0x221   : > { %v2878_v4 = vpack.c.bf16 %v2870_v20, %v2870_v20 }
 0x222   : > { %v2843_v57 = vmax.f32 %v2841_v19, %v2842_v21  ;;  %v2848_v38 = vrot.slane %v2847_v17, 4  ;;  %v2879_v34 = vpack.c.bf16 %v2871_v22, %v2871_v22 }
 0x223   : > { %v2910_v44 = vunpack.c.l.b16 %v2878_v4 }
 0x224   : > { %v2844_v24 = vrot.slane %v2843_v57, 1  ;;  %v2849_v9 = vmax.f32 %v2847_v17, %v2848_v38  ;;  %v2911_v62 = vunpack.c.l.b16 %v2879_v34 }
 0x225   : > { %v2920_v49 = vrot.slane %v2910_v44, 4 }
 0x226   : > { %v2845_v63 = vmax.f32 %v2843_v57, %v2844_v24  ;;  %v2850_v56 = vrot.slane %v2849_v9, 2  ;;  %v2922_v33 = vrot.slane %v2911_v62, 3 }
 0x227   : > { %v2921_v46 = vsel %vm2280_vm7, %v2920_v49, %v2919_v12 }
 0x228   : > { %v2864_v53 = vadd.f32 %v4587_v29, %v2845_v63  ;;  %v2851_v32 = vmax.f32 %v2849_v9, %v2850_v56  ;;  %v2923_v11 = vsel %vm2283_vm8, %v2922_v33, %v2921_v46 }
 0x22a   : > { %v2872_v16 = vmax.f32 %v2864_v53, 0.0  ;;  %v2852_v37 = vrot.slane %v2851_v32, 1 }
 0x22c   : > { %v2880_v27 = vpack.c.bf16 %v2872_v16, %v2872_v16  ;;  %v2853_v41 = vmax.f32 %v2851_v32, %v2852_v37 }
 0x22e   : > { %v2865_v35 = vadd.f32 %v4587_v29, %v2853_v41  ;;  %v2912_v40 = vunpack.c.l.b16 %v2880_v27  ;;  %v3812_v29 = vld [vmem:[#allocation10 + $0x30] sm:$0xff]  }
 0x22f   : > { %3524 = vmatpush3.bf16.msra.mxu1 %v3812_v29 }
 0x230   : > { %v2873_v28 = vmax.f32 %v2865_v35, 0.0  ;;  %v2924_v59 = vrot.slane %v2912_v40, 2  ;;  %3525 = vmatprep.subr.bf16.mxu1 %v4035_v45 }
 0x232   : > { %v2881_v7 = vpack.c.bf16 %v2873_v28, %v2873_v28  ;;  %v2925_v31 = vsel %vm2286_vm9, %v2924_v59, %v2923_v11 }
 0x233   : > { %3526 = vmatpush3.bf16.msra.mxu1 %v3813_v58 }
 0x234   : > { %v2913_v25 = vunpack.c.l.b16 %v2881_v7  ;;  %3527 = vmatprep.subr.bf16.mxu1 %v4035_v45 }
 0x236   : > { %v2926_v50 = vrot.slane %v2913_v25, 1 }
 0x237   : > { %3528 = vmatpush3.bf16.msra.mxu1 %v3814_v42 }
 0x238   : > { %v2927_v51 = vsel %vm2289_vm10, %v2926_v50, %v2925_v31  ;;  %3529 = vmatprep.subr.bf16.mxu1 %v4035_v45 }
 0x239   : > { %v2928_v30 = vpack.c.b16 %v2927_v51, %v2927_v51 }
 0x23b   : > { %3518 = vmatmul.mubr.bf16.vlgmr.msra.gmra.mxu0 %v2928_v30  ;;  %3530 = vmatpush3.bf16.msra.mxu1 %v3815_v48 }
 0x23c   : > { %3531 = vmatprep.subr.bf16.mxu1 %v4035_v45 }
 0x23f   : > { %3532 = vmatpush3.bf16.msra.mxu1 %v3816_v61 }
 0x240   : > { %3533 = vmatprep.subr.bf16.mxu1 %v4035_v45 }
 0x243   : > { %3534 = vmatpush3.bf16.msra.mxu1 %v3817_v2 }
 0x244   : > { %3535 = vmatprep.subr.bf16.mxu1 %v4035_v45 }
 0x247   : > { %3536 = vmatpush3.bf16.msra.mxu1 %v3818_v10 }
 0x279   : > { %v2495_v8 = vpop.f32.mrf.mxu1 }
 0x27b   : > { %v3499_v18 = vpop.f32.mrf.mxu1 }
 0x27d   : > { %v2498_v23 = vpop.f32.mrf.mxu1 }
 0x27f   : > { %v3500_v43 = vpop.f32.mrf.mxu1 }
 0x2bd   : > { %v2375_v5 = vpop.f32.mrf.mxu0 }
 0x2be   : > { %v2496_v52 = vadd.f32 %v2495_v8, %v2375_v5 }
 0x2bf   : > { %v3479_v47 = vpop.f32.mrf.mxu0 }
 0x2c1   : > { %v2378_v3 = vpop.f32.mrf.mxu0 }
 0x2c3   : > { %v3480_v55 = vpop.f32.mrf.mxu0 }
 0x2fb   : > { %v3012_v54 = vpop.f32.mrf.mxu0 }
 0x2fc   : > { %v3018_v60 = vadd.f32 %v3012_v54, %v2496_v52 }
 0x2fd   : > { %v3519_v36 = vpop.f32.mrf.mxu0 }
 0x2fe   : > { %v3026_v15 = vadd.f32 %v3409_v13, %v3018_v60 }
 0x2ff   : > { %v3015_v12 = vpop.f32.mrf.mxu0 }
 0x300   : > { %v3027_v39 = vmax.f32 %v3026_v15, 0.0 }
 0x301   : > { %v3520_v45 = vpop.f32.mrf.mxu0 }
 0x302   : > { %v3028_v19 = vpack.c.bf16 %v3027_v39, %v3027_v39 }
 0x304   : > { %3538 = vmatmul.mubr.bf16.vlgmr.msra.gmra.mxu1 %v3028_v19 }
 0x3c4   : > { %v3134_v6 = vpop.f32.mrf.mxu1 }
 0x3c5   : > { %v3135_v21 = vadd.f32 %v3410_v14, %v3134_v6 }
 0x3c6   : > { %v3539_v17 = vpop.f32.mrf.mxu1 }
 0x3c7   : > { %3140 = vst [vmem:[%s353_s19] sm:$0xff] %v3135_v21 }
 0x3c8   : > { %v3137_v0 = vpop.f32.mrf.mxu1 }
 0x3c9   : > { %3964 = shalt.err (!%p3961_p5)
}
 0x3ca   : > { %s3965_s9 = scalar_lea.hbm %s4704_s14, 128  ;;  %s3969_s20 = scalar_lea.hbm %s4754_s7, 256 }
 0x3cb   : > { %p3966_p0 = scmp.ne.s32.totalorder %s4704_s14, %s3965_s9  ;;  %p3970_p10 = scmp.lt.s32.totalorder %s4704_s14, %s4754_s7 }
 0x3cc   : > { %p3971_p1 = scmp.lt.s32.totalorder %s3969_s20, %s3965_s9 }
 0x3cd   : > { %p3967_p7 = pnand %p3966_p0, %p4778_p8 }
 0x3ce   : > { %p3972_p2 = por %p3971_p1, %p3970_p10 }
 0x3cf   : > { %p3968_p11 = pneg %p3967_p7 }
 0x3d1   : > { %p3973_p4 = pnand %p3972_p2, %p3968_p11 }
 0x3d3   : > { %3976 = shalt.err (!%p3973_p4)
}
 0x3d4   : > { %3559 = dma.vmem_to_hbm [thread:$0]  (%p4778_p8), %s4706_s13, 128, %s4704_s14, %s3142_s1   ;;  %v3540_v26 = vpop.f32.mrf.mxu1 }
 0x3d5 PF: > { %s3167_s19 = sand.u32 1, %s4011_s24   ;;  %p4779_p12 = scmp.ne.s32.totalorder %s4763_s8, 0 }
 0x3d6   : > { %p4780_p6 = scmp.ge.s32.totalorder %s4023_s27, 2  ;;  %s3168_s15 = scalar_lea.sflag [#allocation4], %s3167_s19 }
 0x3d8   : > { %p3579_p3 = pnand %p4780_p6, %p4779_p12 }
 0x3da   : > { %p3580_p9 = pneg %p3579_p3 }
 0x3dc   : > { %4006 = dma.done.wait (%p3580_p9), %s3168_s15, 128  }
 0x3dd   : > { %4008 = vsyncadd (%p3580_p9), %s3168_s15, 4294967168  ;;  %p22_p13 = scmp.ge.s32.totalorder %s4172_s23, 4   ;;  %s4781_s24 = smov %s4015_s25 }
 0x3de   : > { %s4782_s25 = smov %s4019_s26  ;;  %s4783_s26 = smov %s4181_s10 }
 0x3df   : > { %s4784_s27 = smov %s4172_s23  ;;  %24 = sbr.rel (!%p22_p13) target bundleno = 9 (0x9), region = 109 }
 0x3e4   :  { %3173 = vsyncpa [#allocation3], 1 }
 0x3e5   :  { %3175 = vsyncpa [#allocation3 + $0x1], 1 }
 0x3e6   :  { %3176 = vsyncpa [#allocation6], 1 }
 0x3e7   :  { %3177 = vsyncpa [#allocation9], 1 }
 0x3e8   :  { %3178 = vsyncpa [#allocation4], 1 }
 0x3e9   :  { %3180 = vsyncpa [#allocation4 + $0x1], 1 }

</bundles_post_ra>
